<compile_context>
chip_gen: v7x
topology: tpu7x:2x2x1
jax: 0.10.0
libtpu: 0.0.40
codegen_flags: <defaults>
</compile_context>

<pallas_src>
import math
from functools import partial

import jax
import jax.numpy as jnp
from jax import lax
from jax.experimental import pallas as pl
from jax.experimental.pallas import tpu as pltpu


def _layer_norm(y, gamma, beta, eps):
    mean = jnp.mean(y, axis=-1, keepdims=True)
    centered = y - mean
    var = jnp.mean(centered * centered, axis=-1, keepdims=True)
    return centered * lax.rsqrt(var + eps) * gamma + beta


def _erf_approx(x):
    # Abramowitz & Stegun 7.1.26, max abs error ~1.5e-7 (below bf16 noise).
    # Only exp/mul/add plus one EUP reciprocal — always lowers on TPU.
    a1, a2, a3, a4, a5 = (0.254829592, -0.284496736, 1.421413741,
                          -1.453152027, 1.061405429)
    p = 0.3275911
    ax = jnp.abs(x)
    t = pl.reciprocal(1.0 + p * ax, approx=True)   # EUP slot, VPU divide avoided
    poly = ((((a5 * t + a4) * t + a3) * t + a2) * t + a1) * t
    y = 1.0 - poly * jnp.exp(-ax * ax)
    return jnp.where(x >= 0.0, y, -y)


def _gelu_erf(x):
    # Matches the module's erf-based gelu: x * 0.5 * (1 + erf(x / sqrt(2)))
    return x * 0.5 * (1.0 + _erf_approx(x * (1.0 / math.sqrt(2.0))))


def transformer_layer_kernel(x_seq_ref, x_q_ref, mask_ref,
                             wq_ref, bq_ref, wkv_ref, bkv_ref,
                             wd_ref, bd_ref, g1_ref, be1_ref,
                             w1_ref, b1_ref, w2_ref, b2_ref,
                             g2_ref, be2_ref,
                             out_ref, kv_ref, ctx_ref,
                             *, n_heads, head_dim, heads_per_group, ln_eps):
    H = n_heads * head_dim
    inv_sqrt_d = 1.0 / math.sqrt(head_dim)

    # ---- K/V projection: only on the first query tile of each batch element;
    #      result cached in a persistent bf16 VMEM scratch for all other tiles.
    @pl.when(pl.program_id(1) == 0)
    def _():
        x_full_bf = x_seq_ref[0].astype(jnp.bfloat16)                     # (S, H)
        kv = jnp.dot(x_full_bf, wkv_ref[...],
                     preferred_element_type=jnp.float32) + bkv_ref[...]   # (S, 2H)
        kv_ref[...] = kv.astype(jnp.bfloat16)

    x_q = x_q_ref[0]                                  # (TQ, H) f32
    mask = mask_ref[0, 0]                             # (1 or TQ, S) f32, additive

    # ---- Q projection for this tile (bf16 MXU, f32 acc); fold in 1/sqrt(D).
    q = (jnp.dot(x_q.astype(jnp.bfloat16), wq_ref[...],
                 preferred_element_type=jnp.float32) + bq_ref[...]) * inv_sqrt_d

    kv_all = kv_ref[...]                              # (S, 2H) bf16 cached K|V

    # ---- per-head attention in lane-aligned groups, deferred normalization.
    group_w = heads_per_group * head_dim
    for g in range(n_heads // heads_per_group):
        parts = []
        for hh in range(heads_per_group):
            h = g * heads_per_group + hh
            lo = h * head_dim
            q_h = q[:, lo:lo + head_dim].astype(jnp.bfloat16)      # (TQ, D)
            k_h = kv_all[:, lo:lo + head_dim]                      # (S, D)
            v_h = kv_all[:, H + lo:H + lo + head_dim]              # (S, D)

            s = lax.dot_general(q_h, k_h, (((1,), (1,)), ((), ())),
                                preferred_element_type=jnp.float32)
            s = s + mask                                           # (TQ, S)
            m = jnp.max(s, axis=-1, keepdims=True)
            e = jnp.exp(s - m)                                     # unnormalized probs
            denom = jnp.sum(e, axis=-1, keepdims=True)             # (TQ, 1)
            ctx_h = jnp.dot(e.astype(jnp.bfloat16), v_h,
                            preferred_element_type=jnp.float32)    # (TQ, D)
            # Normalize after PV (D mults per row instead of S); exact recip.
            parts.append(ctx_h * pl.reciprocal(denom, approx=False))
        lo_g = g * group_w
        ctx_ref[:, lo_g:lo_g + group_w] = (
            parts[0] if len(parts) == 1 else jnp.concatenate(parts, axis=-1))

    ctx = ctx_ref[...]                                             # (TQ, H) f32

    # ---- attention output projection + residual + LayerNorm 1
    attn = jnp.dot(ctx.astype(jnp.bfloat16), wd_ref[...],
                   preferred_element_type=jnp.float32) + bd_ref[...]
    y1 = _layer_norm(attn + x_q, g1_ref[...], be1_ref[...], ln_eps)

    # ---- feed-forward: dense1 -> gelu(erf) -> dense2 -> residual + LayerNorm 2
    hmid = jnp.dot(y1.astype(jnp.bfloat16), w1_ref[...],
                   preferred_element_type=jnp.float32) + b1_ref[...]
    hmid = _gelu_erf(hmid)
    ffn = jnp.dot(hmid.astype(jnp.bfloat16), w2_ref[...],
                  preferred_element_type=jnp.float32) + b2_ref[...]
    out_ref[0] = _layer_norm(ffn + y1, g2_ref[...], be2_ref[...], ln_eps)


def transformer_layer(x, attention_mask, params, *, n_heads,
                      layer_norm_eps=1e-12, q_tile=None):
    """x: (B, S, H) f32; attention_mask: (B, 1, 1, S) or (B, 1, S, S) additive."""
    B, S, H = x.shape
    assert H % n_heads == 0
    head_dim = H // n_heads

    (wq, bq, wk, bk, wv, bv, wd, bd, g1, be1,
     w1, b1, w2, b2, g2, be2) = params
    inner = w1.shape[1]

    try:
        kind = jax.devices()[0].device_kind.lower()
    except Exception:
        kind = ""
    if q_tile is None:
        # v6e/v7x MXU is 256 wide — 256-row tiles fill it; 128 elsewhere.
        q_tile = 256 if ("v6" in kind or "v7" in kind) else 128
    q_tile = min(q_tile, S)
    assert S % q_tile == 0
    n_qt = S // q_tile

    # Process heads in groups so stores/ctx slabs are 128-lane aligned.
    heads_per_group = max(1, 128 // head_dim) if head_dim < 128 else 1
    heads_per_group = math.gcd(n_heads, heads_per_group)

    # Pack K|V weights/biases; store matmul weights in bf16 (half the VMEM/HBM).
    wq_bf = wq.astype(jnp.bfloat16)                                   # (H, H)
    wkv_bf = jnp.concatenate([wk, wv], axis=1).astype(jnp.bfloat16)   # (H, 2H)
    bkv = jnp.concatenate([bk, bv], axis=1).astype(jnp.float32)       # (1, 2H)
    wd_bf = wd.astype(jnp.bfloat16)
    w1_bf = w1.astype(jnp.bfloat16)
    w2_bf = w2.astype(jnp.bfloat16)

    mq = attention_mask.shape[2]   # 1 → key-padding mask, S → full (q, k) mask
    if mq == 1:
        mask_spec = pl.BlockSpec((1, 1, 1, S), lambda b, t: (b, 0, 0, 0))
    else:
        assert mq == S
        mask_spec = pl.BlockSpec((1, 1, q_tile, S), lambda b, t: (b, 0, t, 0))

    kernel = partial(transformer_layer_kernel, n_heads=n_heads,
                     head_dim=head_dim, heads_per_group=heads_per_group,
                     ln_eps=layer_norm_eps)

    def const_spec(shape):
        return pl.BlockSpec(shape, lambda b, t: (0,) * len(shape))

    grid_spec = pltpu.PrefetchScalarGridSpec(
        num_scalar_prefetch=0,
        grid=(B, n_qt),
        in_specs=[
            # Full sequence (read only at t == 0; block index constant in t so
            # it is DMA'd once per batch element).
            pl.BlockSpec((1, S, H), lambda b, t: (b, 0, 0)),
            # Query tile of x (Q projection + residuals).
            pl.BlockSpec((1, q_tile, H), lambda b, t: (b, t, 0)),
            mask_spec,
            const_spec((H, H)),        # wq (bf16)
            const_spec((1, H)),        # bq
            const_spec((H, 2 * H)),    # wkv (bf16)
            const_spec((1, 2 * H)),    # bkv
            const_spec((H, H)),        # wd (bf16)
            const_spec((1, H)),        # bd
            const_spec((1, H)),        # gamma1
            const_spec((1, H)),        # beta1
            const_spec((H, inner)),    # w1 (bf16)
            const_spec((1, inner)),    # b1
            const_spec((inner, H)),    # w2 (bf16)
            const_spec((1, H)),        # b2
            const_spec((1, H)),        # gamma2
            const_spec((1, H)),        # beta2
        ],
        out_specs=pl.BlockSpec((1, q_tile, H), lambda b, t: (b, t, 0)),
        scratch_shapes=[pltpu.VMEM((S, 2 * H), jnp.bfloat16),   # cached K|V
                        pltpu.VMEM((q_tile, H), jnp.float32)],  # ctx slab
    )

    # v7x has 64 MiB VMEM per TensorCore — keep headroom there.
    vmem_limit = (48 if "v7" in kind else 64) * 1024 * 1024

    return pl.pallas_call(
        kernel,
        out_shape=jax.ShapeDtypeStruct((B, S, H), jnp.float32),
        grid_spec=grid_spec,
        compiler_params=pltpu.CompilerParams(
            # t axis carries the cached-KV scratch → must be "arbitrary".
            dimension_semantics=("parallel", "arbitrary"),
            vmem_limit_bytes=vmem_limit),
    )(x, x, attention_mask, wq_bf, bq, wkv_bf, bkv, wd_bf, bd, g1, be1,
      w1_bf, b1, w2_bf, b2, g2, be2)


def reference_transformer_layer(x, mask, params, *, n_heads, layer_norm_eps):
    """Pure-JAX f32 reference mirroring the PyTorch TransformerLayer (eval mode)."""
    (wq, bq, wk, bk, wv, bv, wd, bd, g1, be1,
     w1, b1, w2, b2, g2, be2) = params
    B, S, H = x.shape
    D = H // n_heads

    def ln(y, g, b):
        mu = jnp.mean(y, axis=-1, keepdims=True)
        var = jnp.var(y, axis=-1, keepdims=True)
        return (y - mu) / jnp.sqrt(var + layer_norm_eps) * g + b

    q = (x @ wq + bq).reshape(B, S, n_heads, D).transpose(0, 2, 1, 3)
    k = (x @ wk + bk).reshape(B, S, n_heads, D).transpose(0, 2, 1, 3)
    v = (x @ wv + bv).reshape(B, S, n_heads, D).transpose(0, 2, 1, 3)
    scores = jnp.einsum('bhqd,bhkd->bhqk', q, k) / math.sqrt(D) + mask
    probs = jax.nn.softmax(scores, axis=-1)
    ctx = jnp.einsum('bhqk,bhkd->bhqd', probs, v).transpose(0, 2, 1, 3).reshape(B, S, H)
    attn = ln(ctx @ wd + bd + x, g1, be1)

    hmid = attn @ w1 + b1
    hmid = hmid * 0.5 * (1.0 + lax.erf(hmid / math.sqrt(2.0)))
    return ln(hmid @ w2 + b2 + attn, g2, be2)


if __name__ == "__main__":
    # Small shapes consistent with the module's forward.
    B, S, H = 2, 8, 32
    INNER = 64
    N_HEADS = 2
    LN_EPS = 1e-12

    key = jax.random.PRNGKey(0)
    keys = jax.random.split(key, 16)
    scale = 0.05

    wq = scale * jax.random.normal(keys[0], (H, H), jnp.float32)
    bq = scale * jax.random.normal(keys[1], (1, H), jnp.float32)
    wk = scale * jax.random.normal(keys[2], (H, H), jnp.float32)
    bk = scale * jax.random.normal(keys[3], (1, H), jnp.float32)
    wv = scale * jax.random.normal(keys[4], (H, H), jnp.float32)
    bv = scale * jax.random.normal(keys[5], (1, H), jnp.float32)
    wd = scale * jax.random.normal(keys[6], (H, H), jnp.float32)
    bd = scale * jax.random.normal(keys[7], (1, H), jnp.float32)
    gamma1 = jnp.ones((1, H), jnp.float32)
    beta1 = jnp.zeros((1, H), jnp.float32)
    w1 = scale * jax.random.normal(keys[8], (H, INNER), jnp.float32)
    b1 = scale * jax.random.normal(keys[9], (1, INNER), jnp.float32)
    w2 = scale * jax.random.normal(keys[10], (INNER, H), jnp.float32)
    b2 = scale * jax.random.normal(keys[11], (1, H), jnp.float32)
    gamma2 = jnp.ones((1, H), jnp.float32)
    beta2 = jnp.zeros((1, H), jnp.float32)

    params = (wq, bq, wk, bk, wv, bv, wd, bd, gamma1, beta1,
              w1, b1, w2, b2, gamma2, beta2)

    x = jax.random.normal(keys[12], (B, S, H), jnp.float32)
    # Additive key-padding mask (broadcast over query rows), masking last 2 keys.
    mask_vec = jnp.where(jnp.arange(S) < S - 2, 0.0, -1e9).astype(jnp.float32)
    attention_mask = jnp.broadcast_to(mask_vec, (B, 1, 1, S)).astype(jnp.float32)

    out = transformer_layer(x, attention_mask, params,
                            n_heads=N_HEADS, layer_norm_eps=LN_EPS)
    out = jax.block_until_ready(out)

    ref = reference_transformer_layer(x, attention_mask, params,
                                      n_heads=N_HEADS, layer_norm_eps=LN_EPS)
    assert out.shape == (B, S, H)
    # bf16 matmuls + erf approximation → relaxed tolerance vs. the f32 reference.
    assert jnp.allclose(out, ref, atol=2e-2, rtol=2e-2), \
        f"max abs err {jnp.max(jnp.abs(out - ref))}"

    print("KERNEL_OK")
</pallas_src>

<mosaic_0001>
module attributes {stable_mosaic.version = 11 : i64} {
  func.func @transformer_layer_kernel(%arg0: i32, %arg1: i32, %arg2: memref<1x8x32xf32, #tpu.memory_space<vmem>>, %arg3: memref<1x8x32xf32, #tpu.memory_space<vmem>>, %arg4: memref<1x1x1x8xf32, #tpu.memory_space<vmem>>, %arg5: memref<32x32xbf16, #tpu.memory_space<vmem>>, %arg6: memref<1x32xf32, #tpu.memory_space<vmem>>, %arg7: memref<32x64xbf16, #tpu.memory_space<vmem>>, %arg8: memref<1x64xf32, #tpu.memory_space<vmem>>, %arg9: memref<32x32xbf16, #tpu.memory_space<vmem>>, %arg10: memref<1x32xf32, #tpu.memory_space<vmem>>, %arg11: memref<1x32xf32, #tpu.memory_space<vmem>>, %arg12: memref<1x32xf32, #tpu.memory_space<vmem>>, %arg13: memref<32x64xbf16, #tpu.memory_space<vmem>>, %arg14: memref<1x64xf32, #tpu.memory_space<vmem>>, %arg15: memref<64x32xbf16, #tpu.memory_space<vmem>>, %arg16: memref<1x32xf32, #tpu.memory_space<vmem>>, %arg17: memref<1x32xf32, #tpu.memory_space<vmem>>, %arg18: memref<1x32xf32, #tpu.memory_space<vmem>>, %arg19: memref<1x8x32xf32, #tpu.memory_space<vmem>>, %arg20: memref<8x64xbf16, #tpu.memory_space<vmem>>, %arg21: memref<8x32xf32, #tpu.memory_space<vmem>>) attributes {dimension_semantics = [#tpu.dimension_semantics<parallel>, #tpu.dimension_semantics<arbitrary>], iteration_bounds = array<i64: 2, 1>, scalar_prefetch = 0 : i64, scratch_operands = 2 : i64, tpu.core_type = #tpu.core_type<tc>, window_params = [{transform_indices = @transform_0, window_bounds = array<i64: 1, 8, 32>}, {transform_indices = @transform_1, window_bounds = array<i64: 1, 8, 32>}, {transform_indices = @transform_2, window_bounds = array<i64: 1, 1, 1, 8>}, {pipeline_mode = #tpu.pipeline_mode<synchronous>, transform_indices = @transform_3, window_bounds = array<i64: 32, 32>}, {pipeline_mode = #tpu.pipeline_mode<synchronous>, transform_indices = @transform_4, window_bounds = array<i64: 1, 32>}, {pipeline_mode = #tpu.pipeline_mode<synchronous>, transform_indices = @transform_5, window_bounds = array<i64: 32, 64>}, {pipeline_mode = #tpu.pipeline_mode<synchronous>, transform_indices = @transform_6, window_bounds = array<i64: 1, 64>}, {pipeline_mode = #tpu.pipeline_mode<synchronous>, transform_indices = @transform_7, window_bounds = array<i64: 32, 32>}, {pipeline_mode = #tpu.pipeline_mode<synchronous>, transform_indices = @transform_8, window_bounds = array<i64: 1, 32>}, {pipeline_mode = #tpu.pipeline_mode<synchronous>, transform_indices = @transform_9, window_bounds = array<i64: 1, 32>}, {pipeline_mode = #tpu.pipeline_mode<synchronous>, transform_indices = @transform_10, window_bounds = array<i64: 1, 32>}, {pipeline_mode = #tpu.pipeline_mode<synchronous>, transform_indices = @transform_11, window_bounds = array<i64: 32, 64>}, {pipeline_mode = #tpu.pipeline_mode<synchronous>, transform_indices = @transform_12, window_bounds = array<i64: 1, 64>}, {pipeline_mode = #tpu.pipeline_mode<synchronous>, transform_indices = @transform_13, window_bounds = array<i64: 64, 32>}, {pipeline_mode = #tpu.pipeline_mode<synchronous>, transform_indices = @transform_14, window_bounds = array<i64: 1, 32>}, {pipeline_mode = #tpu.pipeline_mode<synchronous>, transform_indices = @transform_15, window_bounds = array<i64: 1, 32>}, {pipeline_mode = #tpu.pipeline_mode<synchronous>, transform_indices = @transform_16, window_bounds = array<i64: 1, 32>}, {transform_indices = @transform_17, window_bounds = array<i64: 1, 8, 32>}]} {
    %c0_i32 = arith.constant 0 : i32
    %0 = arith.cmpi eq, %arg1, %c0_i32 : i32
    %1 = arith.extui %0 : i1 to i32
    %c0_i32_0 = arith.constant 0 : i32
    %2 = arith.cmpi ne, %1, %c0_i32_0 : i32
    scf.if %2 {
      %c0_76 = arith.constant 0 : index
      %c0_77 = arith.constant 0 : index
      %c0_78 = arith.constant 0 : index
      %163 = vector.load %arg2[%c0_76, %c0_77, %c0_78] : memref<1x8x32xf32, #tpu.memory_space<vmem>>, vector<1x8x32xf32>
      %164 = vector.shape_cast %163 : vector<1x8x32xf32> to vector<8x32xf32>
      %165 = arith.truncf %164 : vector<8x32xf32> to vector<8x32xbf16>
      %c0_79 = arith.constant 0 : index
      %c0_80 = arith.constant 0 : index
      %166 = vector.load %arg7[%c0_79, %c0_80] : memref<32x64xbf16, #tpu.memory_space<vmem>>, vector<32x64xbf16>
      %cst_81 = arith.constant dense<0.000000e+00> : vector<8x64xf32>
      %167 = tpu.matmul %165, %166, %cst_81 {dimension_numbers = #tpu.dot_dimension_numbers<[1], [0], [0], [1], [0, 0, 1, 1], [], []>} : vector<8x32xbf16>, vector<32x64xbf16>, vector<8x64xf32> -> vector<8x64xf32>
      %c0_82 = arith.constant 0 : index
      %c0_83 = arith.constant 0 : index
      %168 = vector.load %arg8[%c0_82, %c0_83] : memref<1x64xf32, #tpu.memory_space<vmem>>, vector<1x64xf32>
      %169 = vector.broadcast %168 : vector<1x64xf32> to vector<8x64xf32>
      %170 = arith.addf %167, %169 : vector<8x64xf32>
      %171 = arith.truncf %170 : vector<8x64xf32> to vector<8x64xbf16>
      %c0_84 = arith.constant 0 : index
      %c0_85 = arith.constant 0 : index
      %172 = vector.load %arg20[%c0_84, %c0_85] : memref<8x64xbf16, #tpu.memory_space<vmem>>, vector<8x64xbf16>
      tpu.vector_store %arg20[%c0_84, %c0_85], %171 {strides = array<i32>} : memref<8x64xbf16, #tpu.memory_space<vmem>>, vector<8x64xbf16>,
    } else {
    }
    %c0 = arith.constant 0 : index
    %c0_1 = arith.constant 0 : index
    %c0_2 = arith.constant 0 : index
    %3 = vector.load %arg3[%c0, %c0_1, %c0_2] : memref<1x8x32xf32, #tpu.memory_space<vmem>>, vector<1x8x32xf32>
    %4 = vector.shape_cast %3 : vector<1x8x32xf32> to vector<8x32xf32>
    %c0_3 = arith.constant 0 : index
    %c0_4 = arith.constant 0 : index
    %c0_5 = arith.constant 0 : index
    %c0_6 = arith.constant 0 : index
    %5 = vector.load %arg4[%c0_3, %c0_4, %c0_5, %c0_6] : memref<1x1x1x8xf32, #tpu.memory_space<vmem>>, vector<1x1x1x8xf32>
    %6 = vector.shape_cast %5 : vector<1x1x1x8xf32> to vector<1x8xf32>
    %7 = arith.truncf %4 : vector<8x32xf32> to vector<8x32xbf16>
    %c0_7 = arith.constant 0 : index
    %c0_8 = arith.constant 0 : index
    %8 = vector.load %arg5[%c0_7, %c0_8] : memref<32x32xbf16, #tpu.memory_space<vmem>>, vector<32x32xbf16>
    %cst = arith.constant dense<0.000000e+00> : vector<8x32xf32>
    %9 = tpu.matmul %7, %8, %cst {dimension_numbers = #tpu.dot_dimension_numbers<[1], [0], [0], [1], [0, 0, 1, 1], [], []>} : vector<8x32xbf16>, vector<32x32xbf16>, vector<8x32xf32> -> vector<8x32xf32>
    %c0_9 = arith.constant 0 : index
    %c0_10 = arith.constant 0 : index
    %10 = vector.load %arg6[%c0_9, %c0_10] : memref<1x32xf32, #tpu.memory_space<vmem>>, vector<1x32xf32>
    %11 = vector.broadcast %10 : vector<1x32xf32> to vector<8x32xf32>
    %12 = arith.addf %9, %11 : vector<8x32xf32>
    %cst_11 = arith.constant 2.500000e-01 : f32
    %13 = vector.broadcast %cst_11 : f32 to vector<8x32xf32>
    %14 = arith.mulf %12, %13 : vector<8x32xf32>
    %c0_12 = arith.constant 0 : index
    %c0_13 = arith.constant 0 : index
    %15 = vector.load %arg20[%c0_12, %c0_13] : memref<8x64xbf16, #tpu.memory_space<vmem>>, vector<8x64xbf16>
    %16 = vector.extract_strided_slice %14 {offsets = [0, 0], sizes = [8, 16], strides = [1, 1]} : vector<8x32xf32> to vector<8x16xf32>
    %17 = arith.truncf %16 : vector<8x16xf32> to vector<8x16xbf16>
    %18 = vector.extract_strided_slice %15 {offsets = [0, 0], sizes = [8, 16], strides = [1, 1]} : vector<8x64xbf16> to vector<8x16xbf16>
    %19 = vector.extract_strided_slice %15 {offsets = [0, 32], sizes = [8, 16], strides = [1, 1]} : vector<8x64xbf16> to vector<8x16xbf16>
    %cst_14 = arith.constant dense<0.000000e+00> : vector<8x8xf32>
    %20 = tpu.matmul %17, %18, %cst_14 {dimension_numbers = #tpu.dot_dimension_numbers<[1], [1], [0], [0], [0, 0, 1, 0], [], []>} : vector<8x16xbf16>, vector<8x16xbf16>, vector<8x8xf32> -> vector<8x8xf32>
    %21 = vector.broadcast %6 : vector<1x8xf32> to vector<8x8xf32>
    %22 = arith.addf %20, %21 : vector<8x8xf32>
    %cst_15 = arith.constant dense<0xFF800000> : vector<8xf32>
    %23 = vector.multi_reduction <maximumf>, %22, %cst_15 [1] : vector<8x8xf32> to vector<8xf32>
    %24 = vector.shape_cast %23 : vector<8xf32> to vector<8x1xf32>
    %25 = vector.broadcast %24 : vector<8x1xf32> to vector<8x8xf32>
    %26 = arith.subf %22, %25 : vector<8x8xf32>
    %27 = math.exp %26 : vector<8x8xf32>
    %cst_16 = arith.constant dense<0.000000e+00> : vector<8xf32>
    %28 = vector.multi_reduction <add>, %27, %cst_16 [1] : vector<8x8xf32> to vector<8xf32>
    %29 = vector.shape_cast %28 : vector<8xf32> to vector<8x1xf32>
    %30 = arith.truncf %27 : vector<8x8xf32> to vector<8x8xbf16>
    %cst_17 = arith.constant dense<0.000000e+00> : vector<8x16xf32>
    %31 = tpu.matmul %30, %19, %cst_17 {dimension_numbers = #tpu.dot_dimension_numbers<[1], [0], [0], [1], [0, 0, 1, 1], [], []>} : vector<8x8xbf16>, vector<8x16xbf16>, vector<8x16xf32> -> vector<8x16xf32>
    %32 = tpu.reciprocal %29 : vector<8x1xf32> -> vector<8x1xf32>
    %33 = vector.broadcast %32 : vector<8x1xf32> to vector<8x16xf32>
    %34 = arith.mulf %31, %33 : vector<8x16xf32>
    %35 = vector.extract_strided_slice %14 {offsets = [0, 16], sizes = [8, 16], strides = [1, 1]} : vector<8x32xf32> to vector<8x16xf32>
    %36 = arith.truncf %35 : vector<8x16xf32> to vector<8x16xbf16>
    %37 = vector.extract_strided_slice %15 {offsets = [0, 16], sizes = [8, 16], strides = [1, 1]} : vector<8x64xbf16> to vector<8x16xbf16>
    %38 = vector.extract_strided_slice %15 {offsets = [0, 48], sizes = [8, 16], strides = [1, 1]} : vector<8x64xbf16> to vector<8x16xbf16>
    %cst_18 = arith.constant dense<0.000000e+00> : vector<8x8xf32>
    %39 = tpu.matmul %36, %37, %cst_18 {dimension_numbers = #tpu.dot_dimension_numbers<[1], [1], [0], [0], [0, 0, 1, 0], [], []>} : vector<8x16xbf16>, vector<8x16xbf16>, vector<8x8xf32> -> vector<8x8xf32>
    %40 = vector.broadcast %6 : vector<1x8xf32> to vector<8x8xf32>
    %41 = arith.addf %39, %40 : vector<8x8xf32>
    %cst_19 = arith.constant dense<0xFF800000> : vector<8xf32>
    %42 = vector.multi_reduction <maximumf>, %41, %cst_19 [1] : vector<8x8xf32> to vector<8xf32>
    %43 = vector.shape_cast %42 : vector<8xf32> to vector<8x1xf32>
    %44 = vector.broadcast %43 : vector<8x1xf32> to vector<8x8xf32>
    %45 = arith.subf %41, %44 : vector<8x8xf32>
    %46 = math.exp %45 : vector<8x8xf32>
    %cst_20 = arith.constant dense<0.000000e+00> : vector<8xf32>
    %47 = vector.multi_reduction <add>, %46, %cst_20 [1] : vector<8x8xf32> to vector<8xf32>
    %48 = vector.shape_cast %47 : vector<8xf32> to vector<8x1xf32>
    %49 = arith.truncf %46 : vector<8x8xf32> to vector<8x8xbf16>
    %cst_21 = arith.constant dense<0.000000e+00> : vector<8x16xf32>
    %50 = tpu.matmul %49, %38, %cst_21 {dimension_numbers = #tpu.dot_dimension_numbers<[1], [0], [0], [1], [0, 0, 1, 1], [], []>} : vector<8x8xbf16>, vector<8x16xbf16>, vector<8x16xf32> -> vector<8x16xf32>
    %51 = tpu.reciprocal %48 : vector<8x1xf32> -> vector<8x1xf32>
    %52 = vector.broadcast %51 : vector<8x1xf32> to vector<8x16xf32>
    %53 = arith.mulf %50, %52 : vector<8x16xf32>
    %54 = tpu.concatenate %34, %53 in 1 : vector<8x16xf32>, vector<8x16xf32> -> vector<8x32xf32>
    %c0_22 = arith.constant 0 : index
    %c0_23 = arith.constant 0 : index
    %55 = vector.load %arg21[%c0_22, %c0_23] : memref<8x32xf32, #tpu.memory_space<vmem>>, vector<8x32xf32>
    tpu.vector_store %arg21[%c0_22, %c0_23], %54 {strides = array<i32>} : memref<8x32xf32, #tpu.memory_space<vmem>>, vector<8x32xf32>,
    %c0_24 = arith.constant 0 : index
    %c0_25 = arith.constant 0 : index
    %56 = vector.load %arg21[%c0_24, %c0_25] : memref<8x32xf32, #tpu.memory_space<vmem>>, vector<8x32xf32>
    %57 = arith.truncf %56 : vector<8x32xf32> to vector<8x32xbf16>
    %c0_26 = arith.constant 0 : index
    %c0_27 = arith.constant 0 : index
    %58 = vector.load %arg9[%c0_26, %c0_27] : memref<32x32xbf16, #tpu.memory_space<vmem>>, vector<32x32xbf16>
    %cst_28 = arith.constant dense<0.000000e+00> : vector<8x32xf32>
    %59 = tpu.matmul %57, %58, %cst_28 {dimension_numbers = #tpu.dot_dimension_numbers<[1], [0], [0], [1], [0, 0, 1, 1], [], []>} : vector<8x32xbf16>, vector<32x32xbf16>, vector<8x32xf32> -> vector<8x32xf32>
    %c0_29 = arith.constant 0 : index
    %c0_30 = arith.constant 0 : index
    %60 = vector.load %arg10[%c0_29, %c0_30] : memref<1x32xf32, #tpu.memory_space<vmem>>, vector<1x32xf32>
    %61 = vector.broadcast %60 : vector<1x32xf32> to vector<8x32xf32>
    %62 = arith.addf %59, %61 : vector<8x32xf32>
    %63 = arith.addf %62, %4 : vector<8x32xf32>
    %c0_31 = arith.constant 0 : index
    %c0_32 = arith.constant 0 : index
    %64 = vector.load %arg11[%c0_31, %c0_32] : memref<1x32xf32, #tpu.memory_space<vmem>>, vector<1x32xf32>
    %c0_33 = arith.constant 0 : index
    %c0_34 = arith.constant 0 : index
    %65 = vector.load %arg12[%c0_33, %c0_34] : memref<1x32xf32, #tpu.memory_space<vmem>>, vector<1x32xf32>
    %cst_35 = arith.constant dense<0.000000e+00> : vector<8xf32>
    %66 = vector.multi_reduction <add>, %63, %cst_35 [1] : vector<8x32xf32> to vector<8xf32>
    %67 = vector.shape_cast %66 : vector<8xf32> to vector<8x1xf32>
    %cst_36 = arith.constant 3.200000e+01 : f32
    %68 = vector.broadcast %cst_36 : f32 to vector<8x1xf32>
    %69 = arith.divf %67, %68 : vector<8x1xf32>
    %70 = vector.broadcast %69 : vector<8x1xf32> to vector<8x32xf32>
    %71 = arith.subf %63, %70 : vector<8x32xf32>
    %72 = arith.mulf %71, %71 : vector<8x32xf32>
    %cst_37 = arith.constant dense<0.000000e+00> : vector<8xf32>
    %73 = vector.multi_reduction <add>, %72, %cst_37 [1] : vector<8x32xf32> to vector<8xf32>
    %74 = vector.shape_cast %73 : vector<8xf32> to vector<8x1xf32>
    %cst_38 = arith.constant 3.200000e+01 : f32
    %75 = vector.broadcast %cst_38 : f32 to vector<8x1xf32>
    %76 = arith.divf %74, %75 : vector<8x1xf32>
    %cst_39 = arith.constant 9.99999996E-13 : f32
    %77 = vector.broadcast %cst_39 : f32 to vector<8x1xf32>
    %78 = arith.addf %76, %77 : vector<8x1xf32>
    %79 = math.rsqrt %78 : vector<8x1xf32>
    %80 = vector.broadcast %79 : vector<8x1xf32> to vector<8x32xf32>
    %81 = arith.mulf %71, %80 : vector<8x32xf32>
    %82 = vector.broadcast %64 : vector<1x32xf32> to vector<8x32xf32>
    %83 = arith.mulf %81, %82 : vector<8x32xf32>
    %84 = vector.broadcast %65 : vector<1x32xf32> to vector<8x32xf32>
    %85 = arith.addf %83, %84 : vector<8x32xf32>
    %86 = arith.truncf %85 : vector<8x32xf32> to vector<8x32xbf16>
    %c0_40 = arith.constant 0 : index
    %c0_41 = arith.constant 0 : index
    %87 = vector.load %arg13[%c0_40, %c0_41] : memref<32x64xbf16, #tpu.memory_space<vmem>>, vector<32x64xbf16>
    %cst_42 = arith.constant dense<0.000000e+00> : vector<8x64xf32>
    %88 = tpu.matmul %86, %87, %cst_42 {dimension_numbers = #tpu.dot_dimension_numbers<[1], [0], [0], [1], [0, 0, 1, 1], [], []>} : vector<8x32xbf16>, vector<32x64xbf16>, vector<8x64xf32> -> vector<8x64xf32>
    %c0_43 = arith.constant 0 : index
    %c0_44 = arith.constant 0 : index
    %89 = vector.load %arg14[%c0_43, %c0_44] : memref<1x64xf32, #tpu.memory_space<vmem>>, vector<1x64xf32>
    %90 = vector.broadcast %89 : vector<1x64xf32> to vector<8x64xf32>
    %91 = arith.addf %88, %90 : vector<8x64xf32>
    %cst_45 = arith.constant 5.000000e-01 : f32
    %92 = vector.broadcast %cst_45 : f32 to vector<8x64xf32>
    %93 = arith.mulf %91, %92 : vector<8x64xf32>
    %cst_46 = arith.constant 0.707106769 : f32
    %94 = vector.broadcast %cst_46 : f32 to vector<8x64xf32>
    %95 = arith.mulf %91, %94 : vector<8x64xf32>
    %96 = math.absf %95 : vector<8x64xf32>
    %cst_47 = arith.constant 0.327591091 : f32
    %97 = vector.broadcast %cst_47 : f32 to vector<8x64xf32>
    %98 = arith.mulf %97, %96 : vector<8x64xf32>
    %cst_48 = arith.constant 1.000000e+00 : f32
    %99 = vector.broadcast %cst_48 : f32 to vector<8x64xf32>
    %100 = arith.addf %99, %98 : vector<8x64xf32>
    %101 = tpu.reciprocal %100 {approx = true} : vector<8x64xf32> -> vector<8x64xf32>
    %cst_49 = arith.constant 1.06140542 : f32
    %102 = vector.broadcast %cst_49 : f32 to vector<8x64xf32>
    %103 = arith.mulf %102, %101 : vector<8x64xf32>
    %cst_50 = arith.constant -1.45315206 : f32
    %104 = vector.broadcast %cst_50 : f32 to vector<8x64xf32>
    %105 = arith.addf %103, %104 : vector<8x64xf32>
    %106 = arith.mulf %105, %101 : vector<8x64xf32>
    %cst_51 = arith.constant 1.42141378 : f32
    %107 = vector.broadcast %cst_51 : f32 to vector<8x64xf32>
    %108 = arith.addf %106, %107 : vector<8x64xf32>
    %109 = arith.mulf %108, %101 : vector<8x64xf32>
    %cst_52 = arith.constant -0.284496725 : f32
    %110 = vector.broadcast %cst_52 : f32 to vector<8x64xf32>
    %111 = arith.addf %109, %110 : vector<8x64xf32>
    %112 = arith.mulf %111, %101 : vector<8x64xf32>
    %cst_53 = arith.constant 0.254829586 : f32
    %113 = vector.broadcast %cst_53 : f32 to vector<8x64xf32>
    %114 = arith.addf %112, %113 : vector<8x64xf32>
    %115 = arith.mulf %114, %101 : vector<8x64xf32>
    %cst_54 = arith.constant 0.000000e+00 : f32
    %116 = vector.broadcast %cst_54 : f32 to vector<8x64xf32>
    %117 = arith.subf %116, %96 : vector<8x64xf32>
    %118 = arith.mulf %117, %96 : vector<8x64xf32>
    %119 = math.exp %118 : vector<8x64xf32>
    %120 = arith.mulf %115, %119 : vector<8x64xf32>
    %cst_55 = arith.constant 1.000000e+00 : f32
    %121 = vector.broadcast %cst_55 : f32 to vector<8x64xf32>
    %122 = arith.subf %121, %120 : vector<8x64xf32>
    %cst_56 = arith.constant 0.000000e+00 : f32
    %123 = vector.broadcast %cst_56 : f32 to vector<8x64xf32>
    %124 = arith.cmpf oge, %95, %123 : vector<8x64xf32>
    %cst_57 = arith.constant 0.000000e+00 : f32
    %125 = vector.broadcast %cst_57 : f32 to vector<8x64xf32>
    %126 = arith.subf %125, %122 : vector<8x64xf32>
    %127 = arith.select %124, %122, %126 : vector<8x64xi1>, vector<8x64xf32>
    %cst_58 = arith.constant 1.000000e+00 : f32
    %128 = vector.broadcast %cst_58 : f32 to vector<8x64xf32>
    %129 = arith.addf %128, %127 : vector<8x64xf32>
    %130 = arith.mulf %93, %129 : vector<8x64xf32>
    %131 = arith.truncf %130 : vector<8x64xf32> to vector<8x64xbf16>
    %c0_59 = arith.constant 0 : index
    %c0_60 = arith.constant 0 : index
    %132 = vector.load %arg15[%c0_59, %c0_60] : memref<64x32xbf16, #tpu.memory_space<vmem>>, vector<64x32xbf16>
    %cst_61 = arith.constant dense<0.000000e+00> : vector<8x32xf32>
    %133 = tpu.matmul %131, %132, %cst_61 {dimension_numbers = #tpu.dot_dimension_numbers<[1], [0], [0], [1], [0, 0, 1, 1], [], []>} : vector<8x64xbf16>, vector<64x32xbf16>, vector<8x32xf32> -> vector<8x32xf32>
    %c0_62 = arith.constant 0 : index
    %c0_63 = arith.constant 0 : index
    %134 = vector.load %arg16[%c0_62, %c0_63] : memref<1x32xf32, #tpu.memory_space<vmem>>, vector<1x32xf32>
    %135 = vector.broadcast %134 : vector<1x32xf32> to vector<8x32xf32>
    %136 = arith.addf %133, %135 : vector<8x32xf32>
    %137 = arith.addf %136, %85 : vector<8x32xf32>
    %c0_64 = arith.constant 0 : index
    %c0_65 = arith.constant 0 : index
    %138 = vector.load %arg17[%c0_64, %c0_65] : memref<1x32xf32, #tpu.memory_space<vmem>>, vector<1x32xf32>
    %c0_66 = arith.constant 0 : index
    %c0_67 = arith.constant 0 : index
    %139 = vector.load %arg18[%c0_66, %c0_67] : memref<1x32xf32, #tpu.memory_space<vmem>>, vector<1x32xf32>
    %cst_68 = arith.constant dense<0.000000e+00> : vector<8xf32>
    %140 = vector.multi_reduction <add>, %137, %cst_68 [1] : vector<8x32xf32> to vector<8xf32>
    %141 = vector.shape_cast %140 : vector<8xf32> to vector<8x1xf32>
    %cst_69 = arith.constant 3.200000e+01 : f32
    %142 = vector.broadcast %cst_69 : f32 to vector<8x1xf32>
    %143 = arith.divf %141, %142 : vector<8x1xf32>
    %144 = vector.broadcast %143 : vector<8x1xf32> to vector<8x32xf32>
    %145 = arith.subf %137, %144 : vector<8x32xf32>
    %146 = arith.mulf %145, %145 : vector<8x32xf32>
    %cst_70 = arith.constant dense<0.000000e+00> : vector<8xf32>
    %147 = vector.multi_reduction <add>, %146, %cst_70 [1] : vector<8x32xf32> to vector<8xf32>
    %148 = vector.shape_cast %147 : vector<8xf32> to vector<8x1xf32>
    %cst_71 = arith.constant 3.200000e+01 : f32
    %149 = vector.broadcast %cst_71 : f32 to vector<8x1xf32>
    %150 = arith.divf %148, %149 : vector<8x1xf32>
    %cst_72 = arith.constant 9.99999996E-13 : f32
    %151 = vector.broadcast %cst_72 : f32 to vector<8x1xf32>
    %152 = arith.addf %150, %151 : vector<8x1xf32>
    %153 = math.rsqrt %152 : vector<8x1xf32>
    %154 = vector.broadcast %153 : vector<8x1xf32> to vector<8x32xf32>
    %155 = arith.mulf %145, %154 : vector<8x32xf32>
    %156 = vector.broadcast %138 : vector<1x32xf32> to vector<8x32xf32>
    %157 = arith.mulf %155, %156 : vector<8x32xf32>
    %158 = vector.broadcast %139 : vector<1x32xf32> to vector<8x32xf32>
    %159 = arith.addf %157, %158 : vector<8x32xf32>
    %c0_73 = arith.constant 0 : index
    %c0_74 = arith.constant 0 : index
    %c0_75 = arith.constant 0 : index
    %160 = vector.load %arg19[%c0_73, %c0_74, %c0_75] : memref<1x8x32xf32, #tpu.memory_space<vmem>>, vector<1x8x32xf32>
    %161 = vector.shape_cast %160 : vector<1x8x32xf32> to vector<8x32xf32>
    %162 = vector.shape_cast %159 : vector<8x32xf32> to vector<1x8x32xf32>
    tpu.vector_store %arg19[%c0_73, %c0_74, %c0_75], %162 {strides = array<i32>} : memref<1x8x32xf32, #tpu.memory_space<vmem>>, vector<1x8x32xf32>,
    return
  }
  func.func @transform_0(%arg0: i32, %arg1: i32) -> (i32, i32, i32) {
    %c0_i32 = arith.constant 0 : i32
    %c0_i32_0 = arith.constant 0 : i32
    %c0_i32_1 = arith.constant 0 : i32
    return %arg0, %c0_i32, %c0_i32_0 : i32, i32, i32
  }
  func.func @transform_1(%arg0: i32, %arg1: i32) -> (i32, i32, i32) {
    %c0_i32 = arith.constant 0 : i32
    %c0_i32_0 = arith.constant 0 : i32
    return %arg0, %arg1, %c0_i32 : i32, i32, i32
  }
  func.func @transform_2(%arg0: i32, %arg1: i32) -> (i32, i32, i32, i32) {
    %c0_i32 = arith.constant 0 : i32
    %c0_i32_0 = arith.constant 0 : i32
    %c0_i32_1 = arith.constant 0 : i32
    %c0_i32_2 = arith.constant 0 : i32
    return %arg0, %c0_i32, %c0_i32_0, %c0_i32_1 : i32, i32, i32, i32
  }
  func.func @transform_3(%arg0: i32, %arg1: i32) -> (i32, i32) {
    %c0_i32 = arith.constant 0 : i32
    %c0_i32_0 = arith.constant 0 : i32
    %c0_i32_1 = arith.constant 0 : i32
    return %c0_i32, %c0_i32_0 : i32, i32
  }
  func.func @transform_4(%arg0: i32, %arg1: i32) -> (i32, i32) {
    %c0_i32 = arith.constant 0 : i32
    %c0_i32_0 = arith.constant 0 : i32
    %c0_i32_1 = arith.constant 0 : i32
    return %c0_i32, %c0_i32_0 : i32, i32
  }
  func.func @transform_5(%arg0: i32, %arg1: i32) -> (i32, i32) {
    %c0_i32 = arith.constant 0 : i32
    %c0_i32_0 = arith.constant 0 : i32
    %c0_i32_1 = arith.constant 0 : i32
    return %c0_i32, %c0_i32_0 : i32, i32
  }
  func.func @transform_6(%arg0: i32, %arg1: i32) -> (i32, i32) {
    %c0_i32 = arith.constant 0 : i32
    %c0_i32_0 = arith.constant 0 : i32
    %c0_i32_1 = arith.constant 0 : i32
    return %c0_i32, %c0_i32_0 : i32, i32
  }
  func.func @transform_7(%arg0: i32, %arg1: i32) -> (i32, i32) {
    %c0_i32 = arith.constant 0 : i32
    %c0_i32_0 = arith.constant 0 : i32
    %c0_i32_1 = arith.constant 0 : i32
    return %c0_i32, %c0_i32_0 : i32, i32
  }
  func.func @transform_8(%arg0: i32, %arg1: i32) -> (i32, i32) {
    %c0_i32 = arith.constant 0 : i32
    %c0_i32_0 = arith.constant 0 : i32
    %c0_i32_1 = arith.constant 0 : i32
    return %c0_i32, %c0_i32_0 : i32, i32
  }
  func.func @transform_9(%arg0: i32, %arg1: i32) -> (i32, i32) {
    %c0_i32 = arith.constant 0 : i32
    %c0_i32_0 = arith.constant 0 : i32
    %c0_i32_1 = arith.constant 0 : i32
    return %c0_i32, %c0_i32_0 : i32, i32
  }
  func.func @transform_10(%arg0: i32, %arg1: i32) -> (i32, i32) {
    %c0_i32 = arith.constant 0 : i32
    %c0_i32_0 = arith.constant 0 : i32
    %c0_i32_1 = arith.constant 0 : i32
    return %c0_i32, %c0_i32_0 : i32, i32
  }
  func.func @transform_11(%arg0: i32, %arg1: i32) -> (i32, i32) {
    %c0_i32 = arith.constant 0 : i32
    %c0_i32_0 = arith.constant 0 : i32
    %c0_i32_1 = arith.constant 0 : i32
    return %c0_i32, %c0_i32_0 : i32, i32
  }
  func.func @transform_12(%arg0: i32, %arg1: i32) -> (i32, i32) {
    %c0_i32 = arith.constant 0 : i32
    %c0_i32_0 = arith.constant 0 : i32
    %c0_i32_1 = arith.constant 0 : i32
    return %c0_i32, %c0_i32_0 : i32, i32
  }
  func.func @transform_13(%arg0: i32, %arg1: i32) -> (i32, i32) {
    %c0_i32 = arith.constant 0 : i32
    %c0_i32_0 = arith.constant 0 : i32
    %c0_i32_1 = arith.constant 0 : i32
    return %c0_i32, %c0_i32_0 : i32, i32
  }
  func.func @transform_14(%arg0: i32, %arg1: i32) -> (i32, i32) {
    %c0_i32 = arith.constant 0 : i32
    %c0_i32_0 = arith.constant 0 : i32
    %c0_i32_1 = arith.constant 0 : i32
    return %c0_i32, %c0_i32_0 : i32, i32
  }
  func.func @transform_15(%arg0: i32, %arg1: i32) -> (i32, i32) {
    %c0_i32 = arith.constant 0 : i32
    %c0_i32_0 = arith.constant 0 : i32
    %c0_i32_1 = arith.constant 0 : i32
    return %c0_i32, %c0_i32_0 : i32, i32
  }
  func.func @transform_16(%arg0: i32, %arg1: i32) -> (i32, i32) {
    %c0_i32 = arith.constant 0 : i32
    %c0_i32_0 = arith.constant 0 : i32
    %c0_i32_1 = arith.constant 0 : i32
    return %c0_i32, %c0_i32_0 : i32, i32
  }
  func.func @transform_17(%arg0: i32, %arg1: i32) -> (i32, i32, i32) {
    %c0_i32 = arith.constant 0 : i32
    %c0_i32_0 = arith.constant 0 : i32
    return %arg0, %arg1, %c0_i32 : i32, i32, i32
  }
}

</mosaic_0001>

<bundles_post_ra>
// kernel: tpu_custom_call.1
= control target key start
LH: loop header
LB: loop body
LE: loop exit
PB: predicated region body
PF: predicated region fallthrough
CT: control target
= control target key end

     0   :  { %s3589_s0 = inlined_call_operand.hbm [shape: f32[2,8,32], index: 0, kind: input, shape index: {}]   ;;  %s3590_s1 = inlined_call_operand.hbm [shape: f32[2,8,32], index: 1, kind: input, shape index: {}]   ;;  %s3591_s2 = inlined_call_operand.hbm [shape: f32[2,1,1,8], index: 2, kind: input, shape index: {}]   ;;  %s3592_s3 = inlined_call_operand.hbm [shape: bf16[32,32], index: 3, kind: input, shape index: {}]   ;;  %s3593_s4 = inlined_call_operand.hbm [shape: f32[1,32], index: 4, kind: input, shape index: {}]   ;;  %s3594_s5 = inlined_call_operand.hbm [shape: bf16[32,64], index: 5, kind: input, shape index: {}]   ;;  %s3595_s6 = inlined_call_operand.hbm [shape: f32[1,64], index: 6, kind: input, shape index: {}]   ;;  %s3596_s7 = inlined_call_operand.hbm [shape: bf16[32,32], index: 7, kind: input, shape index: {}]   ;;  %s3597_s8 = inlined_call_operand.hbm [shape: f32[1,32], index: 8, kind: input, shape index: {}]   ;;  %s3598_s9 = inlined_call_operand.hbm [shape: f32[1,32], index: 9, kind: input, shape index: {}]   ;;  %s3599_s10 = inlined_call_operand.hbm [shape: f32[1,32], index: 10, kind: input, shape index: {}]   ;;  %s3600_s11 = inlined_call_operand.hbm [shape: bf16[32,64], index: 11, kind: input, shape index: {}]   ;;  %s3601_s12 = inlined_call_operand.hbm [shape: f32[1,64], index: 12, kind: input, shape index: {}]   ;;  %s3602_s13 = inlined_call_operand.hbm [shape: bf16[64,32], index: 13, kind: input, shape index: {}]   ;;  %s3603_s14 = inlined_call_operand.hbm [shape: f32[1,32], index: 14, kind: input, shape index: {}]   ;;  %s3604_s15 = inlined_call_operand.hbm [shape: f32[1,32], index: 15, kind: input, shape index: {}]   ;;  %s3605_s16 = inlined_call_operand.hbm [shape: f32[1,32], index: 16, kind: input, shape index: {}]   ;;  %s3606_s17 = inlined_call_operand.hbm [shape: f32[2,8,32], index: 17, kind: output, shape index: {}]  }
   0x1   :  { %3635 = sst [smem:[#allocation45_spill]] %s3589_s0 }
   0x2   :  { %3636 = sst [smem:[#allocation46_spill]] %s3590_s1 }
   0x3   :  { %3637 = sst [smem:[#allocation47_spill]] %s3591_s2 }
   0x4   :  { %3638 = sst [smem:[#allocation48_spill]] %s3592_s3 }
   0x5   :  { %3639 = sst [smem:[#allocation49_spill]] %s3593_s4 }
   0x6   :  { %3640 = sst [smem:[#allocation50_spill]] %s3594_s5 }
   0x7   :  { %3641 = sst [smem:[#allocation51_spill]] %s3595_s6 }
   0x8   :  { %3642 = sst [smem:[#allocation52_spill]] %s3596_s7 }
   0x9   :  { %3643 = sst [smem:[#allocation53_spill]] %s3597_s8 }
   0xa   :  { %3644 = sst [smem:[#allocation54_spill]] %s3598_s9 }
   0xb   :  { %3645 = sst [smem:[#allocation55_spill]] %s3599_s10 }
   0xc   :  { %3646 = sst [smem:[#allocation56_spill]] %s3600_s11 }
   0xd   :  { %3647 = sst [smem:[#allocation57_spill]] %s3601_s12 }
   0xe   :  { %3648 = sst [smem:[#allocation58_spill]] %s3602_s13 }
   0xf   :  { %3649 = sst [smem:[#allocation59_spill]] %s3603_s14 }
  0x10   :  { %3650 = sst [smem:[#allocation60_spill]] %s3604_s15 }
  0x11   :  { %3651 = sst [smem:[#allocation61_spill]] %s3605_s16 }
  0x12   :  { %3652 = sst [smem:[#allocation62_spill]] %s3606_s17 }
  0x13   :  { %22 = vsyncpa [#allocation5], 0 }
  0x14   :  { %24 = vsyncpa [#allocation5 + $0x1], 0 }
  0x15   :  { %25 = vsyncpa [#allocation8], 0 }
  0x16   :  { %27 = vsyncpa [#allocation8 + $0x1], 0 }
  0x17   :  { %28 = vsyncpa [#allocation11], 0 }
  0x18   :  { %29 = vsyncpa [#allocation14], 0 }
  0x19   :  { %30 = vsyncpa [#allocation17], 0 }
  0x1a   :  { %31 = vsyncpa [#allocation20], 0 }
  0x1b   :  { %32 = vsyncpa [#allocation23], 0 }
  0x1c   :  { %33 = vsyncpa [#allocation26], 0 }
  0x1d   :  { %34 = vsyncpa [#allocation29], 0 }
  0x1e   :  { %35 = vsyncpa [#allocation6], 0 }
  0x1f   :  { %37 = vsyncpa [#allocation6 + $0x1], 0  ;;  %s2928_s24 = smov 0   ;;  %s2930_s25 = smov 0  }
  0x20   :  { %s2932_s26 = smov 0   ;;  %s2934_s27 = smov 0  }
  0x21   :  { %s2936_s28 = smov 0   ;;  %s2938_s29 = smov 0  }
  0x22 LB: > { %3653 = sst [smem:[#allocation42_spill]] %s2802_s27  ;;  %s2959_s0 = sadd.s32 4294967295, %s2810_s29   ;;  %s2810_s29 = sphi %s2938_s29, %s43_s29   ;;  %s2806_s28 = sphi %s2936_s28, %s3718_s28   ;;  %s2802_s27 = sphi %s2934_s27, %s3717_s27   ;;  %s2798_s26 = sphi %s2932_s26, %s3716_s26   ;;  %s2794_s25 = sphi %s2930_s25, %s3715_s25   ;;  %s2790_s24 = sphi %s2928_s24, %s3714_s24  }
  0x23   : > { %p1796_p0 = scmp.ge.s32.totalorder %s2810_s29, 1  ;;  %p3617_p1 = scmp.eq.s32.totalorder %s2959_s0, 0 }
  0x24   : > { %p462_p2 = scmp.lt.s32.totalorder %s2810_s29, 3  ;;  %s2812_s18 = smov [#allocation10]  }
  0x25   : > { %s474_s19 = sshll.u32 %s2812_s18, 4  ;;  %s2813_s20 = smov [#allocation13]   ;;  %s2968_s19 = int_to_ptr.vmem [resolvable:$true] %s474_s19 }
  0x26   : > { %p2964_p3 = pnand %p1796_p0, %p462_p2  ;;  %s498_s21 = sshll.u32 %s2813_s20, 4  ;;  %s2979_s21 = int_to_ptr.vmem [resolvable:$true] %s498_s21 }
  0x27   : > { %s2814_s22 = smov [#allocation16]   ;;  %s3657_s3 = sld [smem:[#allocation48_spill]] }
  0x28   : > { %s3654_s30 = scalar_select %p2964_p3, 1, 0 }
  0x29   : > { %p2028_p4 = pneg %p2964_p3  ;;  %s2981_s23 = sshll.u32 %s2814_s22, 4  ;;  %s523_s23 = int_to_ptr.vmem [resolvable:$true] %s2981_s23 }
  0x2a   : > { %3655 = sst [smem:[#allocation43_spill]] %s3654_s30 }
  0x2b   : > { %p2975_p6 = pnand %p2028_p4, %p3617_p1 }
  0x2d   : > { %s3656_s1 = scalar_select %p2975_p6, 1, 0 }
  0x2e   : > { %s2214_s27 = scalar_lea.hbm %s3657_s3, 256  ;;  %p2991_p8 = pneg %p2975_p6 }
  0x2f   : > { %p2215_p7 = scmp.ne.s32.totalorder %s3657_s3, %s2214_s27  ;;  %p2221_p11 = scmp.lt.u32.totalorder %s2214_s27, %s3657_s3 }
  0x30   : > { %s3658_s16 = scalar_select %p2991_p8, 1, 0 }
  0x31   : > { %p2217_p9 = pnand %p2991_p8, %p2215_p7 }
  0x33   : > { %p2218_p10 = pneg %p2217_p9 }
  0x35   : > { %p2223_p12 = pnand %p2221_p11, %p2218_p10 }
  0x37   : > { %2226 = shalt.err (!%p2223_p12)
}
  0x38   : > { %s2227_s2 = scalar_lea.vmem %s2968_s19, 256  ;;  %p2235_p4 = scmp.lt.s32.totalorder %s2968_s19, %s2968_s19 }
  0x39   : > { %p2228_p13 = scmp.ne.s32.totalorder %s2968_s19, %s2227_s2  ;;  %p2236_p5 = scmp.lt.s32.totalorder %s2227_s2, %s2227_s2 }
  0x3b   : > { %p2230_p0 = pnand %p2228_p13, %p2991_p8  ;;  %p2237_p7 = por %p2236_p5, %p2235_p4 }
  0x3d   : > { %p2231_p2 = pneg %p2230_p0 }
  0x3f   : > { %p2238_p9 = pnand %p2237_p7, %p2231_p2 }
  0x41   : > { %2241 = shalt.err (!%p2238_p9)
}
  0x42   : > { %s2815_s17 = smov 64   ;;  %s2816_s27 = smov 4  }
  0x43   : > { %2031 = dma.hbm_to_vmem [thread:$0]  (!%p2975_p6), %s3657_s3, 256, %s2968_s19, [#allocation11], %s2815_s17, %s2815_s17, %s2816_s27  }
  0x44   : > { %s3659_s5 = sld [smem:[#allocation50_spill]] }
  0x4a   : > { %s2242_s2 = scalar_lea.hbm %s3659_s5, 256 }
  0x4b   : > { %p2243_p5 = scmp.ne.s32.totalorder %s3659_s5, %s2242_s2  ;;  %p2249_p12 = scmp.lt.u32.totalorder %s2242_s2, %s3659_s5 }
  0x4d   : > { %p2245_p10 = pnand %p2243_p5, %p2991_p8 }
  0x4f   : > { %p2246_p11 = pneg %p2245_p10 }
  0x51   : > { %p2251_p13 = pnand %p2249_p12, %p2246_p11 }
  0x53   : > { %2254 = shalt.err (!%p2251_p13)
}
  0x54   : > { %s2255_s19 = scalar_lea.vmem %s2979_s21, 256  ;;  %p2263_p7 = scmp.lt.s32.totalorder %s2979_s21, %s2979_s21 }
  0x55   : > { %p2256_p0 = scmp.ne.s32.totalorder %s2979_s21, %s2255_s19  ;;  %p2264_p9 = scmp.lt.s32.totalorder %s2255_s19, %s2255_s19 }
  0x57   : > { %p2258_p2 = pnand %p2256_p0, %p2991_p8  ;;  %p2265_p5 = por %p2264_p9, %p2263_p7 }
  0x59   : > { %p2259_p4 = pneg %p2258_p2 }
  0x5b   : > { %p2266_p10 = pnand %p2265_p5, %p2259_p4 }
  0x5d   : > { %2269 = shalt.err (!%p2266_p10)
}
  0x5e   : > { %2037 = dma.hbm_to_vmem [thread:$0]  (!%p2975_p6), %s3659_s5, 256, %s2979_s21, [#allocation14], %s2815_s17, %s2815_s17, %s2816_s27  }
  0x5f   : > { %s3660_s7 = sld [smem:[#allocation52_spill]] }
  0x65   : > { %s2270_s30 = scalar_lea.hbm %s3660_s7, 256 }
  0x66   : > { %p2271_p11 = scmp.ne.s32.totalorder %s3660_s7, %s2270_s30  ;;  %p2277_p0 = scmp.lt.u32.totalorder %s2270_s30, %s3660_s7 }
  0x68   : > { %p2273_p12 = pnand %p2271_p11, %p2991_p8 }
  0x6a   : > { %p2274_p13 = pneg %p2273_p12 }
  0x6c   : > { %p2279_p2 = pnand %p2277_p0, %p2274_p13 }
  0x6e   : > { %2282 = shalt.err (!%p2279_p2)
}
  0x6f   : > { %s2283_s19 = scalar_lea.vmem %s523_s23, 256  ;;  %p2291_p5 = scmp.lt.s32.totalorder %s523_s23, %s523_s23 }
  0x70   : > { %p2284_p4 = scmp.ne.s32.totalorder %s523_s23, %s2283_s19  ;;  %p2292_p10 = scmp.lt.s32.totalorder %s2283_s19, %s2283_s19 }
  0x72   : > { %p2286_p7 = pnand %p2284_p4, %p2991_p8  ;;  %p2293_p1 = por %p2292_p10, %p2291_p5 }
  0x74   : > { %p2287_p9 = pneg %p2286_p7 }
  0x76   : > { %p2294_p3 = pnand %p2293_p1, %p2287_p9 }
  0x78   : > { %2297 = shalt.err (!%p2294_p3)
}
  0x79   : > { %2043 = dma.hbm_to_vmem [thread:$0]  (!%p2975_p6), %s3660_s7, 256, %s523_s23, [#allocation17], %s2815_s17, %s2815_s17, %s2816_s27  }
  0x7a   : > { %s2817_s10 = smov [#allocation19]   ;;  %s2818_s14 = smov [#allocation22]  }
  0x7b   : > { %s547_s12 = sshll.u32 %s2817_s10, 4  ;;  %s568_s30 = sshll.u32 %s2818_s14, 4  ;;  %s548_s12 = int_to_ptr.vmem [resolvable:$true] %s547_s12  ;;  %s569_s30 = int_to_ptr.vmem [resolvable:$true] %s568_s30 }
  0x7c   : > { %s3661_s9 = sld [smem:[#allocation54_spill]] }
  0x82   : > { %s2298_s22 = scalar_lea.hbm %s3661_s9, 16 }
  0x83   : > { %p2299_p1 = scmp.ne.s32.totalorder %s3661_s9, %s2298_s22  ;;  %p2305_p12 = scmp.lt.u32.totalorder %s2298_s22, %s3661_s9 }
  0x85   : > { %p2301_p3 = pnand %p2299_p1, %p2991_p8 }
  0x87   : > { %p2302_p11 = pneg %p2301_p3 }
  0x89   : > { %p2307_p13 = pnand %p2305_p12, %p2302_p11 }
  0x8b   : > { %2310 = shalt.err (!%p2307_p13)
}
  0x8c   : > { %s2311_s23 = scalar_lea.vmem %s548_s12, 16  ;;  %s2318_s8 = scalar_lea.vmem %s548_s12, 32 }
  0x8d   : > { %p2312_p0 = scmp.ne.s32.totalorder %s548_s12, %s2311_s23  ;;  %p2319_p7 = scmp.lt.s32.totalorder %s548_s12, %s548_s12 }
  0x8e   : > { %p2320_p9 = scmp.lt.s32.totalorder %s2318_s8, %s2311_s23 }
  0x8f   : > { %p2314_p2 = pnand %p2312_p0, %p2991_p8 }
  0x90   : > { %p2321_p5 = por %p2320_p9, %p2319_p7 }
  0x91   : > { %p2315_p4 = pneg %p2314_p2 }
  0x93   : > { %p2322_p10 = pnand %p2321_p5, %p2315_p4 }
  0x95   : > { %2325 = shalt.err (!%p2322_p10)
}
  0x96   : > { %2049 = dma.hbm_to_vmem [thread:$0]  (!%p2975_p6), %s3661_s9, 16, %s548_s12, [#allocation20]  }
  0x97   : > { %s3662_s11 = sld [smem:[#allocation56_spill]] }
  0x9d   : > { %s2326_s20 = scalar_lea.hbm %s3662_s11, 256 }
  0x9e   : > { %p2327_p1 = scmp.ne.s32.totalorder %s3662_s11, %s2326_s20  ;;  %p2333_p12 = scmp.lt.u32.totalorder %s2326_s20, %s3662_s11 }
  0xa0   : > { %p2329_p3 = pnand %p2327_p1, %p2991_p8 }
  0xa2   : > { %p2330_p11 = pneg %p2329_p3 }
  0xa4   : > { %p2335_p13 = pnand %p2333_p12, %p2330_p11 }
  0xa6   : > { %2338 = shalt.err (!%p2335_p13)
}
  0xa7   : > { %s2339_s23 = scalar_lea.vmem %s569_s30, 256  ;;  %p2347_p7 = scmp.lt.s32.totalorder %s569_s30, %s569_s30 }
  0xa8   : > { %p2340_p0 = scmp.ne.s32.totalorder %s569_s30, %s2339_s23  ;;  %p2348_p9 = scmp.lt.s32.totalorder %s2339_s23, %s2339_s23 }
  0xaa   : > { %p2342_p2 = pnand %p2340_p0, %p2991_p8  ;;  %p2349_p5 = por %p2348_p9, %p2347_p7 }
  0xac   : > { %p2343_p4 = pneg %p2342_p2 }
  0xae   : > { %p2350_p10 = pnand %p2349_p5, %p2343_p4 }
  0xb0   : > { %2353 = shalt.err (!%p2350_p10)
}
  0xb1   : > { %2055 = dma.hbm_to_vmem [thread:$0]  (!%p2975_p6), %s3662_s11, 256, %s569_s30, [#allocation23], %s2815_s17, %s2815_s17, %s2816_s27  }
  0xb2   : > { %s2819_s10 = smov [#allocation25]   ;;  %s2820_s3 = smov [#allocation28]  }
  0xb3   : > { %s592_s14 = sshll.u32 %s2819_s10, 4  ;;  %s617_s18 = sshll.u32 %s2820_s3, 4  ;;  %s593_s14 = int_to_ptr.vmem [resolvable:$true] %s592_s14  ;;  %s618_s18 = int_to_ptr.vmem [resolvable:$true] %s617_s18 }
  0xb4   : > { %s3663_s13 = sld [smem:[#allocation58_spill]] }
  0xba   : > { %s2354_s2 = scalar_lea.hbm %s3663_s13, 512 }
  0xbb   : > { %p2355_p1 = scmp.ne.s32.totalorder %s3663_s13, %s2354_s2  ;;  %p2361_p12 = scmp.lt.u32.totalorder %s2354_s2, %s3663_s13 }
  0xbd   : > { %p2357_p3 = pnand %p2355_p1, %p2991_p8 }
  0xbf   : > { %p2358_p11 = pneg %p2357_p3 }
  0xc1   : > { %p2363_p13 = pnand %p2361_p12, %p2358_p11 }
  0xc3   : > { %2366 = shalt.err (!%p2363_p13)
}
  0xc4   : > { %s2367_s30 = scalar_lea.vmem %s593_s14, 512  ;;  %p2375_p7 = scmp.lt.s32.totalorder %s593_s14, %s593_s14 }
  0xc5   : > { %p2368_p0 = scmp.ne.s32.totalorder %s593_s14, %s2367_s30  ;;  %p2376_p9 = scmp.lt.s32.totalorder %s2367_s30, %s2367_s30 }
  0xc7   : > { %p2370_p2 = pnand %p2368_p0, %p2991_p8  ;;  %p2377_p5 = por %p2376_p9, %p2375_p7 }
  0xc9   : > { %p2371_p4 = pneg %p2370_p2 }
  0xcb   : > { %p2378_p10 = pnand %p2377_p5, %p2371_p4 }
  0xcd   : > { %2381 = shalt.err (!%p2378_p10)
}
  0xce   : > { %2061 = dma.hbm_to_vmem [thread:$0]  (!%p2975_p6), %s3663_s13, 512, %s593_s14, [#allocation26], %s2815_s17, %s2815_s17, %s2816_s27  }
  0xcf   : > { %s3664_s15 = sld [smem:[#allocation60_spill]] }
  0xd5   : > { %s2382_s22 = scalar_lea.hbm %s3664_s15, 16 }
  0xd6   : > { %p2383_p1 = scmp.ne.s32.totalorder %s3664_s15, %s2382_s22  ;;  %p2389_p12 = scmp.lt.u32.totalorder %s2382_s22, %s3664_s15 }
  0xd8   : > { %p2385_p3 = pnand %p2383_p1, %p2991_p8 }
  0xda   : > { %p2386_p11 = pneg %p2385_p3 }
  0xdc   : > { %p2391_p13 = pnand %p2389_p12, %p2386_p11 }
  0xde   : > { %2394 = shalt.err (!%p2391_p13)
}
  0xdf   : > { %s2395_s12 = scalar_lea.vmem %s618_s18, 16  ;;  %s2402_s17 = scalar_lea.vmem %s618_s18, 32 }
  0xe0   : > { %p2396_p0 = scmp.ne.s32.totalorder %s618_s18, %s2395_s12  ;;  %p2403_p7 = scmp.lt.s32.totalorder %s618_s18, %s618_s18 }
  0xe1   : > { %p2404_p9 = scmp.lt.s32.totalorder %s2402_s17, %s2395_s12 }
  0xe2   : > { %p2398_p2 = pnand %p2396_p0, %p2991_p8 }
  0xe3   : > { %p2405_p5 = por %p2404_p9, %p2403_p7 }
  0xe4   : > { %p2399_p4 = pneg %p2398_p2 }
  0xe6   : > { %p2406_p10 = pnand %p2405_p5, %p2399_p4 }
  0xe8   : > { %2409 = shalt.err (!%p2406_p10)
}
  0xe9   : > { %2067 = dma.hbm_to_vmem [thread:$0]  (!%p2975_p6), %s3664_s15, 16, %s618_s18, [#allocation29]  }
  0xea   : > { %s1795_s30 = sadd.s32 4294967294, %s2810_s29   ;;  %s55_s8 = sadd.s32 1, %s2806_s28 }
  0xeb   : > { %s62_s10 = sadd.s32 1, %s2798_s26  ;;  %p57_p1 = scmp.ge.s32.totalorder %s55_s8, 2 }
  0xec   : > { %p69_p3 = scmp.ne.s32.totalorder %s2798_s26, %s2794_s25  ;;  %p70_p11 = scmp.eq.s32.totalorder %s2810_s29, 0 }
  0xed   : > { %p75_p12 = scmp.ne.s32.totalorder %s2794_s25, %s2790_s24  ;;  %s3720_s8 = smov (%p57_p1, %s55_s8), 0 }
  0xee   : > { %3665 = sst [smem:[#allocation44_spill]] %s3720_s8  ;;  %p3151_p13 = por %p70_p11, %p69_p3 }
  0xef   : > { %p3667_p0 = scmp.eq.s32.totalorder %s2959_s0, 0  ;;  %s59_s20 = ssub.s32 %s2806_s28, %s3720_s8 }
  0xf0   : > { %p449_p4 = scmp.eq.s32.totalorder %s2959_s0, 1  ;;  %p60_p7 = scmp.eq.s32.totalorder %s59_s20, 0 }
  0xf1   : > { %p3157_p2 = por %p3667_p0, %p75_p12  ;;  %p455_p9 = scmp.eq.s32.totalorder %s1795_s30, 1 }
  0xf2   : > { %p3164_p5 = por %p449_p4, %p69_p3  ;;  %p2099_p10 = scmp.lt.s32.totalorder %s2810_s29, 2 }
  0xf3   : > { %s3668_s18 = scalar_select %p3157_p2, 1, 0 }
  0xf4   : > { %s3669_s22 = scalar_select %p3164_p5, 1, 0 }
  0xf5   : > { %s3170_s2 = scalar_select %p60_p7, %s2798_s26, %s62_s10  }
  0xf6   : > { %p3172_p1 = por %p455_p9, %p75_p12  ;;  %s3177_s21 = sand.u32 1, %s2798_s26  }
  0xf7   : > { %s3619_s23 = sshll.u32 %s3177_s21, 3  ;;  %s3620_s12 = sshll.u32 %s2806_s28, 7 }
  0xf8   : > { %s3670_s19 = scalar_select %p3172_p1, 1, 0 }
  0xf9   : > { %p3183_p11 = pnand %p2099_p10, %p3151_p13  ;;  %s657_s27 = sand.u32 1, %s2810_s29  }
  0xfa   : > { %s3672_s10 = sld [smem:[#allocation46_spill]]  ;;  %s661_s5 = scalar_lea.vmem [#allocation7], %s3619_s23 }
  0xfb   : > { %s3671_s17 = scalar_select %p3183_p11, 1, 0 }
  0xfc   : > { %s669_s7 = sshll.u32 %s661_s5, 4  ;;  %s2821_s3 = smov [#allocation12]   ;;  %s3197_s7 = int_to_ptr.vmem [resolvable:$true] %s669_s7 }
  0xfd   : > { %s3199_s9 = sshll.u32 %s2821_s3, 4  ;;  %s3201_s11 = scalar_lea.sflag [#allocation8], %s657_s27  ;;  %s489_s9 = int_to_ptr.vmem [resolvable:$true] %s3199_s9 }
  0xfe   : > { %p3207_p12 = pneg %p3183_p11 }
 0x100   : > { %s3193_s20 = scalar_lea.hbm %s3672_s10, %s3620_s12  ;;  %s2415_s23 = scalar_lea.hbm %s3672_s10, 256 }
 0x101   : > { %s2410_s13 = scalar_lea.hbm %s3193_s20, 128  ;;  %p2416_p4 = scmp.lt.u32.totalorder %s3193_s20, %s3672_s10 }
 0x102   : > { %p2411_p3 = scmp.ne.s32.totalorder %s3193_s20, %s2410_s13  ;;  %p2417_p7 = scmp.lt.u32.totalorder %s2415_s23, %s2410_s13 }
 0x103   : > { %s3673_s14 = scalar_select %p3207_p12, 1, 0 }
 0x104   : > { %p2413_p13 = pnand %p3207_p12, %p2411_p3  ;;  %p2418_p9 = por %p2417_p7, %p2416_p4 }
 0x105   : > { %p2419_p10 = scmp.lt.u32.totalorder %s2410_s13, %s3193_s20 }
 0x106   : > { %p2414_p0 = pneg %p2413_p13 }
 0x107   : > { %p2420_p1 = por %p2419_p10, %p2418_p9 }
 0x109   : > { %p2421_p5 = pnand %p2420_p1, %p2414_p0 }
 0x10b   : > { %2424 = shalt.err (!%p2421_p5)
}
 0x10c   : > { %s2425_s27 = scalar_lea.vmem %s3197_s7, 128  ;;  %s2822_s30 = smov [#allocation7]  }
 0x10d   : > { %p2426_p3 = scmp.ne.s32.totalorder %s3197_s7, %s2425_s27  ;;  %s2430_s5 = sshll.u32 %s2822_s30, 4  ;;  %s2431_s5 = int_to_ptr.vmem [resolvable:$false] %s2430_s5 }
 0x10e   : > { %s2432_s12 = scalar_lea.vmem %s2431_s5, 256  ;;  %p2433_p6 = scmp.lt.s32.totalorder %s3197_s7, %s2431_s5 }
 0x10f   : > { %p2428_p13 = pnand %p2426_p3, %p3207_p12  ;;  %p2434_p8 = scmp.lt.s32.totalorder %s2432_s12, %s2425_s27 }
 0x111   : > { %p2429_p2 = pneg %p2428_p13  ;;  %p2435_p4 = por %p2434_p8, %p2433_p6 }
 0x113   : > { %p2436_p7 = pnand %p2435_p4, %p2429_p2 }
 0x115   : > { %2439 = shalt.err (!%p2436_p7)
}
 0x116   : > { %2077 = dma.hbm_to_vmem [thread:$0]  (!%p3183_p11), %s3193_s20, 128, %s3197_s7, %s3201_s11  }
 0x117   : > { %s3674_s4 = sld [smem:[#allocation49_spill]]  ;;  %p3675_p6 = scmp.ne.s32.totalorder %s3658_s16, 0 }
 0x11d   : > { %s2440_s3 = scalar_lea.hbm %s3674_s4, 16 }
 0x11e   : > { %p2441_p5 = scmp.ne.s32.totalorder %s3674_s4, %s2440_s3  ;;  %p2447_p1 = scmp.lt.u32.totalorder %s2440_s3, %s3674_s4 }
 0x120   : > { %p2443_p8 = pnand %p2441_p5, %p3675_p6 }
 0x122   : > { %p2444_p2 = pneg %p2443_p8 }
 0x124   : > { %p2449_p0 = pnand %p2447_p1, %p2444_p2 }
 0x126   : > { %2452 = shalt.err (!%p2449_p0)
}
 0x127   : > { %s2453_s12 = scalar_lea.vmem %s489_s9, 16  ;;  %s2460_s7 = scalar_lea.vmem %s489_s9, 32 }
 0x128   : > { %p2454_p9 = scmp.ne.s32.totalorder %s489_s9, %s2453_s12  ;;  %p2461_p13 = scmp.lt.s32.totalorder %s489_s9, %s489_s9 }
 0x129   : > { %p2462_p4 = scmp.lt.s32.totalorder %s2460_s7, %s2453_s12 }
 0x12a   : > { %p2456_p10 = pnand %p2454_p9, %p3675_p6 }
 0x12b   : > { %p2463_p7 = por %p2462_p4, %p2461_p13 }
 0x12c   : > { %p2457_p3 = pneg %p2456_p10 }
 0x12e   : > { %p2464_p11 = pnand %p2463_p7, %p2457_p3 }
 0x130   : > { %2467 = shalt.err (!%p2464_p11)
}
 0x131   : > { %p3676_p5 = scmp.ne.s32.totalorder %s3656_s1, 0  ;;  %s2823_s13 = smov [#allocation15]  }
 0x132   : > { %s512_s23 = sshll.u32 %s2823_s13, 4  ;;  %s2824_s3 = smov [#allocation18]   ;;  %s513_s23 = int_to_ptr.vmem [resolvable:$true] %s512_s23 }
 0x133   : > { %2034 = dma.hbm_to_vmem [thread:$0]  (!%p3676_p5), %s3674_s4, 16, %s489_s9, [#allocation11]  }
 0x134   : > { %s536_s30 = sshll.u32 %s2824_s3, 4  ;;  %s3677_s6 = sld [smem:[#allocation51_spill]]  ;;  %s537_s30 = int_to_ptr.vmem [resolvable:$true] %s536_s30 }
 0x13a   : > { %s2468_s15 = scalar_lea.hbm %s3677_s6, 16 }
 0x13b   : > { %p2469_p11 = scmp.ne.s32.totalorder %s3677_s6, %s2468_s15  ;;  %p2475_p1 = scmp.lt.u32.totalorder %s2468_s15, %s3677_s6 }
 0x13d   : > { %p2471_p8 = pnand %p2469_p11, %p3675_p6 }
 0x13f   : > { %p2472_p2 = pneg %p2471_p8 }
 0x141   : > { %p2477_p0 = pnand %p2475_p1, %p2472_p2 }
 0x143   : > { %2480 = shalt.err (!%p2477_p0)
}
 0x144   : > { %s2481_s9 = scalar_lea.vmem %s513_s23, 16  ;;  %s2488_s20 = scalar_lea.vmem %s513_s23, 32 }
 0x145   : > { %p2482_p9 = scmp.ne.s32.totalorder %s513_s23, %s2481_s9  ;;  %p2489_p13 = scmp.lt.s32.totalorder %s513_s23, %s513_s23 }
 0x146   : > { %p2490_p4 = scmp.lt.s32.totalorder %s2488_s20, %s2481_s9 }
 0x147   : > { %p2484_p10 = pnand %p2482_p9, %p3675_p6 }
 0x148   : > { %p2491_p7 = por %p2490_p4, %p2489_p13 }
 0x149   : > { %p2485_p3 = pneg %p2484_p10 }
 0x14b   : > { %p2492_p12 = pnand %p2491_p7, %p2485_p3 }
 0x14d   : > { %2495 = shalt.err (!%p2492_p12)
}
 0x14e   : > { %2040 = dma.hbm_to_vmem [thread:$0]  (!%p3676_p5), %s3677_s6, 16, %s513_s23, [#allocation14]  }
 0x14f   : > { %s3678_s27 = sld [smem:[#allocation53_spill]] }
 0x155   : > { %s3679_s5 = smov %s3678_s27  ;;  %s2496_s12 = scalar_lea.hbm %s3678_s27, 16 }
 0x156   : > { %p2497_p11 = scmp.ne.s32.totalorder %s3679_s5, %s2496_s12  ;;  %p2503_p12 = scmp.lt.u32.totalorder %s2496_s12, %s3679_s5 }
 0x158   : > { %p2499_p8 = pnand %p2497_p11, %p3675_p6 }
 0x15a   : > { %p2500_p2 = pneg %p2499_p8 }
 0x15c   : > { %p2505_p1 = pnand %p2503_p12, %p2500_p2 }
 0x15e   : > { %2508 = shalt.err (!%p2505_p1)
}
 0x15f   : > { %s2509_s13 = scalar_lea.vmem %s537_s30, 16  ;;  %s2516_s23 = scalar_lea.vmem %s537_s30, 32 }
 0x160   : > { %p2510_p0 = scmp.ne.s32.totalorder %s537_s30, %s2509_s13  ;;  %p2517_p3 = scmp.lt.s32.totalorder %s537_s30, %s537_s30 }
 0x161   : > { %p2518_p13 = scmp.lt.s32.totalorder %s2516_s23, %s2509_s13 }
 0x162   : > { %p2512_p9 = pnand %p2510_p0, %p3675_p6 }
 0x163   : > { %p2519_p4 = por %p2518_p13, %p2517_p3 }
 0x164   : > { %p2513_p10 = pneg %p2512_p9 }
 0x166   : > { %p2520_p7 = pnand %p2519_p4, %p2513_p10 }
 0x168   : > { %2523 = shalt.err (!%p2520_p7)
}
 0x169   : > { %2046 = dma.hbm_to_vmem [thread:$0]  (!%p3676_p5), %s3679_s5, 16, %s537_s30, [#allocation17]  }
 0x16a   : > { %s2825_s8 = smov [#allocation21]   ;;  %s2826_s12 = smov [#allocation24]  }
 0x16b   : > { %s558_s27 = sshll.u32 %s2825_s8, 4  ;;  %s582_s7 = sshll.u32 %s2826_s12, 4  ;;  %s559_s27 = int_to_ptr.vmem [resolvable:$true] %s558_s27  ;;  %s583_s7 = int_to_ptr.vmem [resolvable:$true] %s582_s7 }
 0x16c   : > { %s3680_s20 = sld [smem:[#allocation55_spill]] }
 0x172   : > { %s2524_s4 = scalar_lea.hbm %s3680_s20, 16 }
 0x173   : > { %p2525_p11 = scmp.ne.s32.totalorder %s3680_s20, %s2524_s4  ;;  %p2531_p12 = scmp.lt.u32.totalorder %s2524_s4, %s3680_s20 }
 0x175   : > { %p2527_p8 = pnand %p2525_p11, %p3675_p6 }
 0x177   : > { %p2528_p2 = pneg %p2527_p8 }
 0x179   : > { %p2533_p1 = pnand %p2531_p12, %p2528_p2 }
 0x17b   : > { %2536 = shalt.err (!%p2533_p1)
}
 0x17c   : > { %s2537_s30 = scalar_lea.vmem %s559_s27, 16  ;;  %s2544_s15 = scalar_lea.vmem %s559_s27, 32 }
 0x17d   : > { %p2538_p0 = scmp.ne.s32.totalorder %s559_s27, %s2537_s30  ;;  %p2545_p3 = scmp.lt.s32.totalorder %s559_s27, %s559_s27 }
 0x17e   : > { %p2546_p13 = scmp.lt.s32.totalorder %s2544_s15, %s2537_s30 }
 0x17f   : > { %p2540_p9 = pnand %p2538_p0, %p3675_p6 }
 0x180   : > { %p2547_p4 = por %p2546_p13, %p2545_p3 }
 0x181   : > { %p2541_p10 = pneg %p2540_p9 }
 0x183   : > { %p2548_p7 = pnand %p2547_p4, %p2541_p10 }
 0x185   : > { %2551 = shalt.err (!%p2548_p7)
}
 0x186   : > { %2052 = dma.hbm_to_vmem [thread:$0]  (!%p3676_p5), %s3680_s20, 16, %s559_s27, [#allocation20]  }
 0x187   : > { %s3681_s10 = sld [smem:[#allocation57_spill]] }
 0x18d   : > { %s2552_s9 = scalar_lea.hbm %s3681_s10, 16 }
 0x18e   : > { %p2553_p11 = scmp.ne.s32.totalorder %s3681_s10, %s2552_s9  ;;  %p2559_p12 = scmp.lt.u32.totalorder %s2552_s9, %s3681_s10 }
 0x190   : > { %p2555_p8 = pnand %p2553_p11, %p3675_p6 }
 0x192   : > { %p2556_p2 = pneg %p2555_p8 }
 0x194   : > { %p2561_p1 = pnand %p2559_p12, %p2556_p2 }
 0x196   : > { %2564 = shalt.err (!%p2561_p1)
}
 0x197   : > { %s2565_s15 = scalar_lea.vmem %s583_s7, 16  ;;  %s2572_s27 = scalar_lea.vmem %s583_s7, 32 }
 0x198   : > { %p2566_p0 = scmp.ne.s32.totalorder %s583_s7, %s2565_s15  ;;  %p2573_p3 = scmp.lt.s32.totalorder %s583_s7, %s583_s7 }
 0x199   : > { %p2574_p13 = scmp.lt.s32.totalorder %s2572_s27, %s2565_s15 }
 0x19a   : > { %p2568_p9 = pnand %p2566_p0, %p3675_p6 }
 0x19b   : > { %p2575_p4 = por %p2574_p13, %p2573_p3 }
 0x19c   : > { %p2569_p10 = pneg %p2568_p9 }
 0x19e   : > { %p2576_p7 = pnand %p2575_p4, %p2569_p10 }
 0x1a0   : > { %2579 = shalt.err (!%p2576_p7)
}
 0x1a1   : > { %2058 = dma.hbm_to_vmem [thread:$0]  (!%p3676_p5), %s3681_s10, 16, %s583_s7, [#allocation23]  }
 0x1a2   : > { %s2827_s4 = smov [#allocation27]   ;;  %s2828_s9 = smov [#allocation30]  }
 0x1a3   : > { %s606_s6 = sshll.u32 %s2827_s4, 4  ;;  %s628_s13 = sshll.u32 %s2828_s9, 4  ;;  %s607_s6 = int_to_ptr.vmem [resolvable:$true] %s606_s6  ;;  %s629_s13 = int_to_ptr.vmem [resolvable:$true] %s628_s13 }
 0x1a4   : > { %s3682_s30 = sld [smem:[#allocation59_spill]] }
 0x1aa   : > { %s2580_s5 = scalar_lea.hbm %s3682_s30, 16 }
 0x1ab   : > { %p2581_p11 = scmp.ne.s32.totalorder %s3682_s30, %s2580_s5  ;;  %p2587_p12 = scmp.lt.u32.totalorder %s2580_s5, %s3682_s30 }
 0x1ad   : > { %p2583_p8 = pnand %p2581_p11, %p3675_p6 }
 0x1af   : > { %p2584_p2 = pneg %p2583_p8 }
 0x1b1   : > { %p2589_p1 = pnand %p2587_p12, %p2584_p2 }
 0x1b3   : > { %2592 = shalt.err (!%p2589_p1)
}
 0x1b4   : > { %s2593_s7 = scalar_lea.vmem %s607_s6, 16  ;;  %s2600_s12 = scalar_lea.vmem %s607_s6, 32 }
 0x1b5   : > { %p2594_p0 = scmp.ne.s32.totalorder %s607_s6, %s2593_s7  ;;  %p2601_p3 = scmp.lt.s32.totalorder %s607_s6, %s607_s6 }
 0x1b6   : > { %p2602_p13 = scmp.lt.s32.totalorder %s2600_s12, %s2593_s7 }
 0x1b7   : > { %p2596_p9 = pnand %p2594_p0, %p3675_p6 }
 0x1b8   : > { %p2603_p4 = por %p2602_p13, %p2601_p3 }
 0x1b9   : > { %p2597_p10 = pneg %p2596_p9 }
 0x1bb   : > { %p2604_p7 = pnand %p2603_p4, %p2597_p10 }
 0x1bd   : > { %2607 = shalt.err (!%p2604_p7)
}
 0x1be   : > { %2064 = dma.hbm_to_vmem [thread:$0]  (!%p3676_p5), %s3682_s30, 16, %s607_s6, [#allocation26]  }
 0x1bf   : > { %s3683_s23 = sld [smem:[#allocation61_spill]] }
 0x1c5   : > { %s2608_s3 = scalar_lea.hbm %s3683_s23, 16 }
 0x1c6   : > { %p2609_p11 = scmp.ne.s32.totalorder %s3683_s23, %s2608_s3  ;;  %p2615_p12 = scmp.lt.u32.totalorder %s2608_s3, %s3683_s23 }
 0x1c8   : > { %p2611_p8 = pnand %p2609_p11, %p3675_p6 }
 0x1ca   : > { %p2612_p2 = pneg %p2611_p8 }
 0x1cc   : > { %p2617_p1 = pnand %p2615_p12, %p2612_p2 }
 0x1ce   : > { %2620 = shalt.err (!%p2617_p1)
}
 0x1cf   : > { %s2621_s12 = scalar_lea.vmem %s629_s13, 16  ;;  %s2628_s6 = scalar_lea.vmem %s629_s13, 32 }
 0x1d0   : > { %p2622_p0 = scmp.ne.s32.totalorder %s629_s13, %s2621_s12  ;;  %p2629_p3 = scmp.lt.s32.totalorder %s629_s13, %s629_s13 }
 0x1d1   : > { %p2630_p13 = scmp.lt.s32.totalorder %s2628_s6, %s2621_s12 }
 0x1d2   : > { %p2624_p9 = pnand %p2622_p0, %p3675_p6 }
 0x1d3   : > { %p2631_p4 = por %p2630_p13, %p2629_p3 }
 0x1d4   : > { %p2625_p10 = pneg %p2624_p9 }
 0x1d6   : > { %p2632_p7 = pnand %p2631_p4, %p2625_p10 }
 0x1d8   : > { %2635 = shalt.err (!%p2632_p7)
}
 0x1d9   : > { %2070 = dma.hbm_to_vmem [thread:$0]  (!%p3676_p5), %s3683_s23, 16, %s629_s13, [#allocation29]  }
 0x1da   : > { %s3684_s16 = sshll.u32 %s2806_s28, 7  ;;  %s3685_s3 = sld [smem:[#allocation45_spill]] }
 0x1db   : > { %s3686_s27 = sshll.u32 %s3177_s21, 3  ;;  %s1816_s7 = sshll.u32 %s2806_s28, 4 }
 0x1dc   : > { %s643_s1 = scalar_lea.vmem [#allocation4], %s3686_s27  ;;  %s640_s12 = scalar_lea.sflag [#allocation5], %s3177_s21 }
 0x1dd   : > { %s650_s8 = sshll.u32 %s643_s1, 4  ;;  %p3687_p5 = scmp.ne.s32.totalorder %s3673_s14, 0  ;;  %s3367_s8 = int_to_ptr.vmem [resolvable:$true] %s650_s8 }
 0x1e0   : > { %s3363_s15 = scalar_lea.hbm %s3685_s3, %s3684_s16  ;;  %s2641_s9 = scalar_lea.hbm %s3685_s3, 256 }
 0x1e1   : > { %s2636_s6 = scalar_lea.hbm %s3363_s15, 128  ;;  %p2642_p2 = scmp.lt.u32.totalorder %s3363_s15, %s3685_s3 }
 0x1e2   : > { %p2637_p6 = scmp.ne.s32.totalorder %s3363_s15, %s2636_s6  ;;  %p2643_p12 = scmp.lt.u32.totalorder %s2641_s9, %s2636_s6 }
 0x1e3   : > { %p2645_p0 = scmp.lt.u32.totalorder %s2636_s6, %s3363_s15 }
 0x1e4   : > { %p2639_p11 = pnand %p2637_p6, %p3687_p5  ;;  %p2644_p1 = por %p2643_p12, %p2642_p2 }
 0x1e6   : > { %p2640_p8 = pneg %p2639_p11  ;;  %p2646_p9 = por %p2645_p0, %p2644_p1 }
 0x1e8   : > { %p2647_p10 = pnand %p2646_p9, %p2640_p8 }
 0x1ea   : > { %2650 = shalt.err (!%p2647_p10)
}
 0x1eb   : > { %s2651_s20 = scalar_lea.vmem %s3367_s8, 128  ;;  %s2829_s27 = smov [#allocation4]  }
 0x1ec   : > { %p2652_p3 = scmp.ne.s32.totalorder %s3367_s8, %s2651_s20  ;;  %s2656_s1 = sshll.u32 %s2829_s27, 4  ;;  %s2657_s1 = int_to_ptr.vmem [resolvable:$false] %s2656_s1 }
 0x1ed   : > { %s2658_s13 = scalar_lea.vmem %s2657_s1, 256  ;;  %p2659_p7 = scmp.lt.s32.totalorder %s3367_s8, %s2657_s1 }
 0x1ee   : > { %p2654_p13 = pnand %p2652_p3, %p3687_p5  ;;  %p2660_p6 = scmp.lt.s32.totalorder %s2658_s13, %s2651_s20 }
 0x1f0   : > { %p2655_p4 = pneg %p2654_p13  ;;  %p2661_p11 = por %p2660_p6, %p2659_p7 }
 0x1f2   : > { %p2662_p2 = pnand %p2661_p11, %p2655_p4 }
 0x1f4   : > { %2665 = shalt.err (!%p2662_p2)
}
 0x1f5   : > { %p3688_p8 = scmp.ne.s32.totalorder %s3671_s17, 0  ;;  %s3689_s9 = sld [smem:[#allocation47_spill]] }
 0x1f6   : > { %s679_s5 = scalar_lea.vmem [#allocation9], %s3177_s21 }
 0x1f7   : > { %2074 = dma.hbm_to_vmem [thread:$0]  (!%p3688_p8), %s3363_s15, 128, %s3367_s8, %s640_s12  }
 0x1f8   : > { %s686_s20 = sshll.u32 %s679_s5, 4  ;;  %s687_s20 = int_to_ptr.vmem [resolvable:$true] %s686_s20 }
 0x1fb   : > { %s3397_s16 = scalar_lea.hbm %s3689_s9, %s1816_s7  ;;  %s2671_s8 = scalar_lea.hbm %s3689_s9, 32 }
 0x1fc   : > { %s2666_s27 = scalar_lea.hbm %s3397_s16, 16  ;;  %p2672_p9 = scmp.lt.u32.totalorder %s3397_s16, %s3689_s9 }
 0x1fd   : > { %p2667_p12 = scmp.ne.s32.totalorder %s3397_s16, %s2666_s27  ;;  %p2673_p10 = scmp.lt.u32.totalorder %s2671_s8, %s2666_s27 }
 0x1fe   : > { %p2675_p13 = scmp.lt.u32.totalorder %s2666_s27, %s3397_s16 }
 0x1ff   : > { %p2669_p1 = pnand %p2667_p12, %p3687_p5  ;;  %p2674_p3 = por %p2673_p10, %p2672_p9 }
 0x201   : > { %p2670_p0 = pneg %p2669_p1  ;;  %p2676_p4 = por %p2675_p13, %p2674_p3 }
 0x203   : > { %p2677_p7 = pnand %p2676_p4, %p2670_p0 }
 0x205   : > { %2680 = shalt.err (!%p2677_p7)
}
 0x206   : > { %s2681_s21 = scalar_lea.vmem %s687_s20, 16  ;;  %s2830_s7 = smov [#allocation9]  }
 0x207   : > { %p2682_p6 = scmp.ne.s32.totalorder %s687_s20, %s2681_s21  ;;  %s2686_s6 = sshll.u32 %s2830_s7, 4  ;;  %s2687_s6 = int_to_ptr.vmem [resolvable:$false] %s2686_s6 }
 0x208   : > { %s2688_s4 = scalar_lea.vmem %s2687_s6, 32  ;;  %p2689_p12 = scmp.lt.s32.totalorder %s687_s20, %s2687_s6 }
 0x209   : > { %p2684_p11 = pnand %p2682_p6, %p3687_p5  ;;  %p2690_p1 = scmp.lt.s32.totalorder %s2688_s4, %s2681_s21 }
 0x20b   : > { %p2685_p2 = pneg %p2684_p11  ;;  %p2691_p8 = por %p2690_p1, %p2689_p12 }
 0x20d   : > { %p2692_p9 = pnand %p2691_p8, %p2685_p2 }
 0x20f   : > { %2695 = shalt.err (!%p2692_p9)
}
 0x210   : > { %p3690_p10 = scmp.ne.s32.totalorder %s3671_s17, 0  ;;  %s3691_s5 = sld [smem:[#allocation43_spill]] }
 0x212   : > { %2080 = dma.hbm_to_vmem [thread:$0]  (!%p3690_p10), %s3397_s16, 16, %s687_s20, %s3201_s11  }
 0x216   : > { %p3692_p0 = scmp.ne.s32.totalorder %s3691_s5, 0 }
 0x217   : > { %s3421_s14 = sand.u32 (!%p3692_p0), 1, %s2794_s25   ;;  %p3693_p5 = scmp.ne.s32.totalorder (!%p3692_p0), %s3668_s18, 0 }
 0x218   : > { %695 = sbr.rel (%p3692_p0) target bundleno = 2980 (0xba4), region = 88  ;;  %s3424_s27 = sshll.u32 (!%p3692_p0), %s3421_s14, 3 }
 0x219   : > { %s698_s1 = scalar_lea.sflag (!%p3692_p0), [#allocation5], %s3421_s14  ;;  %s701_s15 = scalar_lea.vmem (!%p3692_p0), [#allocation4], %s3424_s27 }
 0x21f   : > { %2749 = dma.done.wait (%p3693_p5), %s698_s1, 128  }
 0x220   : > { %2751 = vsyncadd (%p3693_p5), %s698_s1, 4294967168  ;;  %s706_s11 = sand.u32 1, %s2959_s0   ;;  %s710_s16 = scalar_lea.vmem [#allocation7], %s3424_s27 }
 0x221   : > { %s707_s17 = scalar_lea.sflag [#allocation8], %s706_s11 }
 0x222   : > { %2753 = dma.done.wait (%p3693_p5), %s707_s17, 144  }
 0x223   : > { %2755 = vsyncadd (%p3693_p5), %s707_s17, 4294967152  ;;  %s718_s20 = scalar_lea.vmem [#allocation9], %s3421_s14  ;;  %p3694_p8 = scmp.eq.s32.totalorder %s2959_s0, 0 }
 0x225   : > { %2757 = dma.done.wait (%p3694_p8), [#allocation11], 272   ;;  %p3695_p3 = pmov %p3694_p8 }
 0x227   : > { %2759 = vsyncadd (%p3695_p3), [#allocation11], 4294967024  ;;  %p3696_p13 = pmov %p3695_p3 }
 0x228   : > { %p3697_p4 = pmov %p3695_p3 }
 0x229   : > { %2761 = dma.done.wait (%p3696_p13), [#allocation14], 272  }
 0x22a   : > { %2763 = vsyncadd (%p3697_p4), [#allocation14], 4294967024  ;;  %p3698_p7 = pmov %p3695_p3 }
 0x22b   : > { %p3699_p6 = pmov %p3695_p3 }
 0x22c   : > { %2765 = dma.done.wait (%p3698_p7), [#allocation17], 272  }
 0x22d   : > { %2767 = vsyncadd (%p3699_p6), [#allocation17], 4294967024  ;;  %p3700_p11 = pmov %p3695_p3 }
 0x22e   : > { %p3701_p2 = pmov %p3695_p3 }
 0x22f   : > { %2769 = dma.done.wait (%p3700_p11), [#allocation20], 32  }
 0x230   : > { %2771 = vsyncadd (%p3701_p2), [#allocation20], 4294967264  ;;  %p3702_p12 = pmov %p3701_p2 }
 0x231   : > { %p3703_p1 = pmov %p3701_p2 }
 0x232   : > { %2773 = dma.done.wait (%p3702_p12), [#allocation23], 272  }
 0x233   : > { %2775 = vsyncadd (%p3703_p1), [#allocation23], 4294967024  ;;  %p3704_p9 = pmov %p3703_p1 }
 0x234   : > { %p3705_p10 = pmov %p3703_p1 }
 0x235   : > { %2777 = dma.done.wait (%p3704_p9), [#allocation26], 528  }
 0x236   : > { %2779 = vsyncadd (%p3705_p10), [#allocation26], 4294966768  ;;  %p3706_p0 = pmov %p3703_p1 }
 0x238   : > { %2781 = dma.done.wait (%p3706_p0), [#allocation29], 32   ;;  %p3707_p5 = pmov %p3706_p0 }
 0x239   : > { %v2831_v0 = vmov 0.0   ;;  %vm2832_vm0 = vmmov 0   ;;  %v2185_v1 = vld [vmem:[#allocation13] sm:$0xff]   ;;  %v2186_v2 = vld [vmem:[#allocation13 + $0x8] sm:$0xff]   ;;  %vm864_vm1 = vcmask 261120   ;;  %v2188_v6 = vld [vmem:[#allocation10 + $0x8] sm:$0xff]  }
 0x23a   : > { %2783 = vsyncadd (%p3707_p5), [#allocation29], 4294967264  ;;  %1896 = vmatprep.subr.bf16.mxu1 %v2831_v0  ;;  %1900 = vmatprep.mubr.msk.bf16.mxu1 %vm2832_vm0, %v2831_v0  ;;  %v839_v3 = vld [vmem:[%s701_s15] sm:$0xff]  ;;  %v3482_v7 = vld [vmem:[%s710_s16] sm:$0xff]  ;;  %vm909_vm2 = vcmask 519168   ;;  %vm990_vm3 = vcmask 130048  }
 0x23b   : > { %1912 = vmatprep.subr.bf16.mxu0 %v2831_v0  ;;  %1914 = vmatprep.mubr.msk.bf16.mxu0 %vm2832_vm0, %v2831_v0  ;;  %v2187_v4 = vld [vmem:[#allocation10] sm:$0xff]   ;;  %v840_v5 = vpack.c.bf16 %v839_v3, %v839_v3  ;;  %v913_v8 = vpack.c.bf16 %v3482_v7, %v3482_v7  ;;  %v1839_v16 = vld [vmem:[#allocation12] ss:$0 sm:$0xff]  ;;  %s2833_s0 = smov 112   ;;  %s2834_s18 = smov 96   ;;  %vm1056_vm4 = vcmask 1043456  }
 0x23c   : > { %1897 = vmatpush3.bf16.msra.mxu1 %v2185_v1  ;;  %v1835_v9 = vld [vmem:[#allocation15] ss:$0 sm:$0xff]  ;;  %v1843_v32 = vld [vmem:[%s718_s20] ss:$0 sm:$0xff]  ;;  %vm1037_vm5 = vcmask 64512   ;;  %s2835_s8 = smov 80  }
 0x23d   : > { %1898 = vmatprep.subr.bf16.mxu1 %v2831_v0  ;;  %v2190_v1 = vld [vmem:[#allocation16] sm:$0xff]   ;;  %s2836_s12 = smov 16   ;;  %vm1451_vm7 = vcmask 523264   ;;  %s3708_s13 = sld [smem:[#allocation42_spill]] }
 0x23e   : > { %s833_s7 = scalar_lea.vmem [#allocation31], %s3424_s27  ;;  %s3709_s1 = sld [smem:[#allocation62_spill]] }
 0x23f   : > { %s1541_s6 = sshll.u32 %s833_s7, 4  ;;  %s1527_s11 = scalar_lea.sflag [#allocation6], %s3421_s14  ;;  %s3541_s6 = int_to_ptr.vmem [resolvable:$true] %s1541_s6 }
 0x240   : > { %1899 = vmatpush3.bf16.msra.mxu1 %v2186_v2  ;;  %v2191_v2 = vld [vmem:[#allocation16 + $0x8] sm:$0xff]   ;;  %s2696_s17 = scalar_lea.vmem %s3541_s6, 128  ;;  %p3710_p3 = scmp.ne.s32.totalorder %s3669_s22, 0 }
 0x241   : > { %1904 = vmatprep.subr.bf16.mxu1 %v2831_v0  ;;  %p2697_p8 = scmp.ne.s32.totalorder %s3541_s6, %s2696_s17  ;;  %s2837_s27 = smov [#allocation31]  }
 0x242   : > { %s2700_s16 = sshll.u32 %s2837_s27, 4  ;;  %s2701_s16 = int_to_ptr.vmem [resolvable:$false] %s2700_s16 }
 0x243   : > { %1901 = vmatmul.mubr.msk.bf16.vlgmr.msra.gmra.mrb[0].mxu1 %vm864_vm1, %v840_v5  ;;  %s1868_s21 = sshll.u32 %s3708_s13, 7  ;;  %p2698_p13 = pnand %p2697_p8, %p3710_p3 }
 0x244   : > { %1905 = vmatpush3.bf16.msra.mxu1 %v2187_v4  ;;  %1908 = vmatprep.mubr.msk.bf16.mxu1 %vm2832_vm0, %v2831_v0  ;;  %s3539_s15 = scalar_lea.hbm %s3709_s1, %s1868_s21  ;;  %s2702_s20 = scalar_lea.vmem %s2701_s16, 256 }
 0x245   : > { %1906 = vmatprep.subr.bf16.mxu1 %v2831_v0  ;;  %p2699_p4 = pneg %p2698_p13  ;;  %p2703_p7 = scmp.lt.s32.totalorder %s3541_s6, %s2701_s16 }
 0x246   : > { %p2704_p6 = scmp.lt.s32.totalorder %s2702_s20, %s2696_s17 }
 0x248   : > { %1907 = vmatpush3.bf16.msra.mxu1 %v2188_v6  ;;  %p2705_p11 = por %p2704_p6, %p2703_p7 }
 0x249   : > { %1918 = vmatprep.subr.bf16.mxu1 %v2831_v0 }
 0x24a   : > { %p2706_p2 = pnand %p2705_p11, %p2699_p4 }
 0x24b   : > { %1909 = vmatmul.mubr.msk.bf16.vlgmr.msra.gmra.mrb[4].mxu1 %vm864_vm1, %v913_v8 }
 0x24c   : > { %1920 = vmatprep.mubr.msk.bf16.mxu1 %vm2832_vm0, %v2831_v0 }
 0x316   : > { %v902_v10 = vpop.f32.mrb[0].mxu1 }
 0x317   : > { %v903_v11 = vadd.f32 %v1835_v9, %v902_v10  ;;  %v1902_v12 = vpop.f32.mrb[1].mxu1 }
 0x318   : > { %v905_v13 = vpop.f32.mrb[2].mxu1 }
 0x319   : > { %v908_v14 = vpack.c.bf16 %v903_v11, %v903_v11  ;;  %v1903_v15 = vpop.f32.mrb[3].mxu1 }
 0x31b   : > { %910 = vst.msk [vmem:[#allocation2] sm:$0xf] %vm909_vm2, %v908_v14 }
 0x31e   : > { %v975_v17 = vpop.f32.mrb[4].mxu1 }
 0x31f   : > { %v976_v18 = vadd.f32 %v1839_v16, %v975_v17  ;;  %v1910_v19 = vpop.f32.mrb[5].mxu1  ;;  %v1849_v17 = vld [vmem:[#allocation18] ss:$0 sm:$0xff] }
 0x320   : > { %v978_v20 = vpop.f32.mrb[6].mxu1 }
 0x321   : > { %v981_v21 = vmul.f32 0.25, %v976_v18  ;;  %v1911_v22 = vpop.f32.mrb[7].mxu1 }
 0x322   : > { %v982_v23 = vld [vmem:[#allocation2] sm:$0xf] }
 0x323   : > { %v995_v24 = vsel %vm990_vm3, %v982_v23, 0  ;;  %v1845_v25 = vcombine.low %v982_v23, %v982_v23  ;;  %v983_v26 = vpack.c.bf16 %v981_v21, %v981_v21 }
 0x324   : > { %1913 = vmatpush3.bf16.xpose.msra.mxu0 %v995_v24 }
 0x325   : > { %1105 = vrot.lane.b32.xlu0 %v1845_v25, %s2833_s0  ;;  %1924 = vmatprep.subr.bf16.mxu0 %v2831_v0 }
 0x329   : > { %1103 = vrot.lane.b32.xlu0 %v983_v26, %s2833_s0 }
 0x32b   : > { %1915 = vmatmul.mubr.msk.bf16.vlgmr.msra.gmra.mrb[0].mxu0 %vm990_vm3, %v983_v26 }
 0x32c   : > { %1926 = vmatprep.mubr.msk.bf16.mxu0 %vm2832_vm0, %v2831_v0 }
 0x32d   : > { %1051 = vrot.lane.b32.xlu0 %v1845_v25, %s2834_s18 }
 0x397   : > { %v1106_v27 = vpop.permute.xlu0 %1105 }
 0x398   : > { %v1111_v28 = vsel %vm990_vm3, %v1106_v27, 0 }
 0x399   : > { %1925 = vmatpush3.bf16.xpose.msra.mxu0 %v1111_v28 }
 0x39a   : > { %1936 = vmatprep.subr.bf16.mxu0 %v2831_v0 }
 0x39b   : > { %v1104_v29 = vpop.permute.xlu0 %1103 }
 0x39f   : > { %v1052_v30 = vpop.permute.xlu0 %1051 }
 0x3a0   : > { %v1058_v31 = vsel %vm1056_vm4, %v1052_v30, 0  ;;  %1927 = vmatmul.mubr.msk.bf16.vlgmr.msra.gmra.mrb[4].mxu0 %vm990_vm3, %v1104_v29  ;;  %v2192_v30 = vld [vmem:[#allocation22] sm:$0xff]  }
 0x3a1   : > { %1919 = vmatpush3.bf16.msra.mxu1 %v1058_v31  ;;  %1940 = vmatprep.mubr.msk.bf16.mxu0 %vm2832_vm0, %v2831_v0  ;;  %v2193_v31 = vld [vmem:[#allocation22 + $0x8] sm:$0xff]  }
 0x3a2   : > { %1930 = vmatprep.subr.bf16.mxu1 %v2831_v0  ;;  %1937 = vmatpush3.bf16.msra.mxu0 %v2190_v1 }
 0x3a3   : > { %1938 = vmatprep.subr.bf16.mxu0 %v2831_v0 }
 0x3a6   : > { %1939 = vmatpush3.bf16.msra.mxu0 %v2191_v2 }
 0x3a7   : > { %1952 = vmatprep.subr.bf16.mxu0 %v2831_v0 }
 0x3fe   : > { %v1031_v33 = vpop.f32.mrb[0].mxu0 }
 0x3ff   : > { %v1032_v34 = vadd.f32 %v1843_v32, %v1031_v33  ;;  %v1916_v35 = vpop.f32.mrb[1].mxu0 }
 0x400   : > { %v1034_v36 = vpop.f32.mrb[2].mxu0  ;;  %v1853_v35 = vld [vmem:[#allocation19] ss:$0 sm:$0xff] }
 0x401   : > { %v1917_v37 = vpop.f32.mrb[3].mxu0  ;;  %v1038_v38 = vsel %vm1037_vm5, %v1032_v34, -inf }
 0x402   : > { %1039 = vmax.xlane.f32.xlu1 %v1038_v38  ;;  %v1854_v37 = vld [vmem:[#allocation21] ss:$0 sm:$0xff] }
 0x473   : > { %v1147_v39 = vpop.f32.mrb[4].mxu0 }
 0x474   : > { %v1148_v40 = vadd.f32 %v1843_v32, %v1147_v39  ;;  %v1928_v41 = vpop.f32.mrb[5].mxu0 }
 0x475   : > { %v1150_v42 = vpop.f32.mrb[6].mxu0  ;;  %v2194_v41 = vld [vmem:[#allocation25] sm:$0xff]  }
 0x476   : > { %v1929_v43 = vpop.f32.mrb[7].mxu0  ;;  %v1153_v44 = vsel %vm1037_vm5, %v1148_v40, -inf  ;;  %v2195_v42 = vld [vmem:[#allocation25 + $0x8] sm:$0xff]  }
 0x477   : > { %1154 = vmax.xlane.f32.xlu1 %v1153_v44  ;;  %v2196_v43 = vld [vmem:[#allocation25 + $0x10] sm:$0xff]   ;;  %v2197_v44 = vld [vmem:[#allocation25 + $0x18] sm:$0xff]  }
 0x488   : > { %1163 = vrot.lane.b32.xlu1 %v1845_v25, %s2835_s8 }
 0x48f   : > { %v1040_v45 = vpop.xlane.xlu1 %1039 }
 0x490   : > { %v1041_v46 = vsub.f32 %v1032_v34, %v1040_v45  ;;  %v1855_v45 = vld [vmem:[#allocation24] ss:$0 sm:$0xff] }
 0x492   : > { %v1042_v47 = vmul.f32 1.442695, %v1041_v46 }
 0x494   : > { %2198 = vpow2.f32 %v1042_v47 }
 0x49e   : > { %v2199_v48 = vpop.eup %2198 }
 0x49f   : > { %v1047_v49 = vpack.c.bf16 %v2199_v48, %v2199_v48  ;;  %v1044_v50 = vsel %vm1037_vm5, %v2199_v48, 0.0 }
 0x4a1   : > { %1921 = vmatmul.mubr.msk.bf16.vlgmr.msra.gmra.mrb[8].mxu1 %vm1037_vm5, %v1047_v49 }
 0x4a2   : > { %1932 = vmatprep.mubr.msk.bf16.mxu1 %vm2832_vm0, %v2831_v0 }
 0x4ac   : > { %1045 = vadd.xlane.f32.xlu1 %v1044_v50 }
 0x504   : > { %v1155_v51 = vpop.xlane.xlu1 %1154 }
 0x505   : > { %v1156_v52 = vsub.f32 %v1148_v40, %v1155_v51 }
 0x507   : > { %v1157_v53 = vmul.f32 1.442695, %v1156_v52 }
 0x508   : > { %v1164_v54 = vpop.permute.xlu1 %1163 }
 0x509   : > { %2200 = vpow2.f32 %v1157_v53  ;;  %v1169_v55 = vsel %vm1056_vm4, %v1164_v54, 0 }
 0x50a   : > { %1931 = vmatpush3.bf16.msra.mxu1 %v1169_v55 }
 0x50b   : > { %1944 = vmatprep.subr.bf16.mxu1 %v2831_v0 }
 0x513   : > { %v2201_v56 = vpop.eup %2200 }
 0x514   : > { %v1159_v57 = vsel %vm1037_vm5, %v2201_v56, 0.0  ;;  %v1162_v58 = vpack.c.bf16 %v2201_v56, %v2201_v56 }
 0x515   : > { %1160 = vadd.xlane.f32.xlu0 %v1159_v57 }
 0x516   : > { %1933 = vmatmul.mubr.msk.bf16.vlgmr.msra.gmra.mrb[12].mxu1 %vm1037_vm5, %v1162_v58 }
 0x517   : > { %1948 = vmatprep.mubr.msk.bf16.mxu1 %vm2832_vm0, %v2831_v0  ;;  %1945 = vmatpush3.bf16.msra.mxu1 %v2192_v30 }
 0x518   : > { %1946 = vmatprep.subr.bf16.mxu1 %v2831_v0 }
 0x51b   : > { %1947 = vmatpush3.bf16.msra.mxu1 %v2193_v31  ;;  %v1865_v31 = vld [vmem:[#allocation28] ss:$0 sm:$0xff] }
 0x539   : > { %v1046_v10 = vpop.xlane.xlu1 %1045 }
 0x574   : > { %v1094_v59 = vpop.f32.mrb[8].mxu1 }
 0x575   : > { %v1922_v60 = vpop.f32.mrb[9].mxu1 }
 0x576   : > { %v1097_v61 = vpop.f32.mrb[10].mxu1 }
 0x577   : > { %v1923_v62 = vpop.f32.mrb[11].mxu1 }
 0x5a2   : > { %v1161_v63 = vpop.xlane.xlu0 %1160 }
 0x5a3   : > { %2202 = vrcp.f32 %v1161_v63 }
 0x5a4   : > { %2204 = vrcp.f32 %v1046_v10 }
 0x5ad   : > { %v2203_v3 = vpop.eup %2202 }
 0x5ae   : > { %v2205_v11 = vpop.eup %2204 }
 0x5af   : > { %v1101_v12 = vmul.f32 %v2205_v11, %v1094_v59 }
 0x5e9   : > { %v1205_v4 = vpop.f32.mrb[12].mxu1 }
 0x5ea   : > { %v1212_v5 = vmul.f32 %v2203_v3, %v1205_v4  ;;  %v1934_v6 = vpop.f32.mrb[13].mxu1 }
 0x5eb   : > { %v1208_v8 = vpop.f32.mrb[14].mxu1 }
 0x5ec   : > { %1214 = vrot.lane.b32.xlu0 %v1212_v5, %s2836_s12  ;;  %v1935_v9 = vpop.f32.mrb[15].mxu1 }
 0x65e   : > { %v1215_v13 = vpop.permute.xlu0 %1214 }
 0x65f   : > { %v1217_v14 = vsel %vm990_vm3, %v1101_v12, %v1215_v13 }
 0x660   : > { %1218 = vst.msk [vmem:[#allocation3] sm:$0xff] %vm864_vm1, %v1217_v14  ;;  %v1859_v14 = vld [vmem:[#allocation27] ss:$0 sm:$0xff] }
 0x667   : > { %v1219_v15 = vld [vmem:[#allocation3] sm:$0xff] }
 0x668   : > { %v1220_v16 = vpack.c.bf16 %v1219_v15, %v1219_v15 }
 0x66a   : > { %1941 = vmatmul.mubr.msk.bf16.vlgmr.msra.gmra.mrb[8].mxu0 %vm864_vm1, %v1220_v16 }
 0x66b   : > { %1960 = vmatprep.mubr.msk.bf16.mxu0 %vm2832_vm0, %v2831_v0  ;;  %1953 = vmatpush3.bf16.msra.mxu0 %v2194_v41 }
 0x66c   : > { %1954 = vmatprep.subr.bf16.mxu0 %v2831_v0 }
 0x66f   : > { %1955 = vmatpush3.bf16.msra.mxu0 %v2195_v42 }
 0x670   : > { %1956 = vmatprep.subr.bf16.mxu0 %v2831_v0 }
 0x673   : > { %1957 = vmatpush3.bf16.msra.mxu0 %v2196_v43 }
 0x674   : > { %1958 = vmatprep.subr.bf16.mxu0 %v2831_v0 }
 0x677   : > { %1959 = vmatpush3.bf16.msra.mxu0 %v2197_v44 }
 0x73d   : > { %v1281_v18 = vpop.f32.mrb[8].mxu0 }
 0x73e   : > { %v1282_v19 = vadd.f32 %v1849_v17, %v1281_v18  ;;  %v1942_v20 = vpop.f32.mrb[9].mxu0 }
 0x73f   : > { %v1284_v21 = vpop.f32.mrb[10].mxu0 }
 0x740   : > { %v1943_v22 = vpop.f32.mrb[11].mxu0  ;;  %v1287_v23 = vadd.f32 %v1282_v19, %v3482_v7 }
 0x742   : > { %v1290_v24 = vsel %vm864_vm1, %v1287_v23, 0.0 }
 0x743   : > { %1291 = vadd.xlane.f32.xlu1 %v1290_v24 }
 0x7d0   : > { %v1292_v25 = vpop.xlane.xlu1 %1291 }
 0x7d1   : > { %v1294_v26 = vmul.f32 0.03125, %v1292_v25 }
 0x7d3   : > { %v1295_v27 = vsub.f32 %v1287_v23, %v1294_v26 }
 0x7d5   : > { %v1296_v28 = vmul.f32 %v1295_v27, %v1295_v27 }
 0x7d7   : > { %v1297_v29 = vsel %vm864_vm1, %v1296_v28, 0.0 }
 0x7d8   : > { %1298 = vadd.xlane.f32.xlu0 %v1297_v29 }
 0x865   : > { %v1299_v32 = vpop.xlane.xlu0 %1298 }
 0x866   : > { %v1300_v33 = vmul.f32 0.03125, %v1299_v32 }
 0x868   : > { %v1301_v34 = vadd.f32 1e-12, %v1300_v33  ;;  %v1866_v33 = vld [vmem:[#allocation30] ss:$0 sm:$0xff] }
 0x86a   : > { %2206 = vrsqrt.f32 %v1301_v34 }
 0x874   : > { %v2207_v7 = vpop.eup %2206 }
 0x875   : > { %v1303_v36 = vmul.f32 %v2207_v7, %v1295_v27 }
 0x877   : > { %v1310_v38 = vmul.f32 %v1853_v35, %v1303_v36 }
 0x879   : > { %v1317_v39 = vadd.f32 %v1854_v37, %v1310_v38 }
 0x87b   : > { %v1318_v40 = vpack.c.bf16 %v1317_v39, %v1317_v39 }
 0x87d   : > { %1949 = vmatmul.mubr.msk.bf16.vlgmr.msra.gmra.mrb[16].mxu1 %vm864_vm1, %v1318_v40 }
 0x950   : > { %v1379_v46 = vpop.f32.mrb[16].mxu1 }
 0x951   : > { %v1380_v47 = vadd.f32 %v1855_v45, %v1379_v46  ;;  %v1950_v48 = vpop.f32.mrb[17].mxu1 }
 0x952   : > { %v1382_v49 = vpop.f32.mrb[18].mxu1 }
 0x953   : > { %v1386_v50 = vmul.f32 0.70710677, %v1380_v47  ;;  %v1951_v51 = vpop.f32.mrb[19].mxu1  ;;  %v1385_v10 = vmul.f32 0.5, %v1380_v47 }
 0x955   : > { %v1387_v52 = vand.u32 2147483647, %v1386_v50  ;;  %vm1406_vm6 = vcmp.ge.f32.partialorder %v1386_v50, 0.0 }
 0x957   : > { %v1388_v53 = vmul.f32 0.3275911, %v1387_v52  ;;  %v1400_v55 = vsub.f32 0.0, %v1387_v52 }
 0x959   : > { %v1389_v54 = vadd.f32 1.0, %v1388_v53  ;;  %v1401_v57 = vmul.f32 %v1400_v55, %v1387_v52 }
 0x95b   : > { %2208 = vrcp.f32 %v1389_v54  ;;  %v1402_v60 = vmul.f32 1.442695, %v1401_v57 }
 0x95d   : > { %2210 = vpow2.f32 %v1402_v60 }
 0x965   : > { %v2209_v56 = vpop.eup %2208 }
 0x966   : > { %v1391_v58 = vmul.f32 1.0614054, %v2209_v56 }
 0x967   : > { %v2211_v4 = vpop.eup %2210 }
 0x968   : > { %v1392_v59 = vadd.f32 -1.4531521, %v1391_v58 }
 0x96a   : > { %v1393_v0 = vmul.f32 %v2209_v56, %v1392_v59 }
 0x96c   : > { %v1394_v61 = vadd.f32 1.4214138, %v1393_v0 }
 0x96e   : > { %v1395_v62 = vmul.f32 %v2209_v56, %v1394_v61 }
 0x970   : > { %v1396_v63 = vadd.f32 -0.28449672, %v1395_v62 }
 0x972   : > { %v1397_v1 = vmul.f32 %v2209_v56, %v1396_v63 }
 0x974   : > { %v1398_v2 = vadd.f32 0.2548296, %v1397_v1 }
 0x976   : > { %v1399_v3 = vmul.f32 %v2209_v56, %v1398_v2 }
 0x978   : > { %v1404_v5 = vmul.f32 %v2211_v4, %v1399_v3 }
 0x97a   : > { %v1405_v6 = vsub.f32 1.0, %v1404_v5 }
 0x97c   : > { %v1407_v8 = vsub.f32 0.0, %v1405_v6 }
 0x97e   : > { %v1408_v9 = vsel %vm1406_vm6, %v1405_v6, %v1407_v8 }
 0x97f   : > { %v1409_v11 = vadd.f32 1.0, %v1408_v9 }
 0x981   : > { %v1410_v12 = vmul.f32 %v1409_v11, %v1385_v10 }
 0x983   : > { %v1411_v13 = vpack.c.bf16 %v1410_v12, %v1410_v12 }
 0x985   : > { %1961 = vmatmul.mubr.msk.bf16.vlgmr.msra.gmra.mrb[12].mxu0 %vm1451_vm7, %v1411_v13 }
 0xa58   : > { %v1489_v15 = vpop.f32.mrb[12].mxu0 }
 0xa59   : > { %v1490_v16 = vadd.f32 %v1859_v14, %v1489_v15  ;;  %v1962_v17 = vpop.f32.mrb[13].mxu0 }
 0xa5a   : > { %v1492_v18 = vpop.f32.mrb[14].mxu0 }
 0xa5b   : > { %v1963_v19 = vpop.f32.mrb[15].mxu0  ;;  %v1495_v20 = vadd.f32 %v1490_v16, %v1317_v39 }
 0xa5d   : > { %v1498_v21 = vsel %vm864_vm1, %v1495_v20, 0.0 }
 0xa5e   : > { %1499 = vadd.xlane.f32.xlu1 %v1498_v21 }
 0xaeb   : > { %v1500_v22 = vpop.xlane.xlu1 %1499 }
 0xaec   : > { %v1501_v23 = vmul.f32 0.03125, %v1500_v22 }
 0xaee   : > { %v1502_v24 = vsub.f32 %v1495_v20, %v1501_v23 }
 0xaf0   : > { %v1503_v25 = vmul.f32 %v1502_v24, %v1502_v24 }
 0xaf2   : > { %v1504_v26 = vsel %vm864_vm1, %v1503_v25, 0.0 }
 0xaf3   : > { %1505 = vadd.xlane.f32.xlu1 %v1504_v26 }
 0xb80   : > { %v1506_v27 = vpop.xlane.xlu1 %1505 }
 0xb81   : > { %v1507_v28 = vmul.f32 0.03125, %v1506_v27 }
 0xb83   : > { %v1508_v29 = vadd.f32 1e-12, %v1507_v28 }
 0xb85   : > { %2212 = vrsqrt.f32 %v1508_v29 }
 0xb8f   : > { %v2213_v30 = vpop.eup %2212 }
 0xb90   : > { %v1510_v32 = vmul.f32 %v2213_v30, %v1502_v24 }
 0xb92   : > { %v1517_v34 = vmul.f32 %v1865_v31, %v1510_v32 }
 0xb94   : > { %v1524_v7 = vadd.f32 %v1866_v33, %v1517_v34 }
 0xb96   : > { %1525 = vst.msk [vmem:[%s833_s7] sm:$0xff] %vm864_vm1, %v1524_v7 }
 0xb97   : > { %2709 = shalt.err (!%p2706_p2)
}
 0xb98   : > { %s2710_s14 = scalar_lea.hbm %s3539_s15, 128  ;;  %s2714_s8 = scalar_lea.hbm %s3709_s1, 256 }
 0xb99   : > { %p2711_p12 = scmp.ne.s32.totalorder %s3539_s15, %s2710_s14  ;;  %p2715_p10 = scmp.lt.u32.totalorder %s3539_s15, %s3709_s1 }
 0xb9a   : > { %p2716_p0 = scmp.lt.u32.totalorder %s2714_s8, %s2710_s14  ;;  %p2718_p8 = scmp.lt.u32.totalorder %s2710_s14, %s3539_s15 }
 0xb9b   : > { %p2712_p1 = pnand %p2711_p12, %p3710_p3 }
 0xb9c   : > { %p2717_p5 = por %p2716_p0, %p2715_p10 }
 0xb9d   : > { %p2713_p9 = pneg %p2712_p1 }
 0xb9e   : > { %p2719_p13 = por %p2718_p8, %p2717_p5 }
 0xba0   : > { %p2720_p4 = pnand %p2719_p13, %p2713_p9 }
 0xba2   : > { %2723 = shalt.err (!%p2720_p4)
}
 0xba3   : > { %2026 = dma.vmem_to_hbm [thread:$0]  (%p3710_p3), %s3541_s6, 128, %s3539_s15, %s1527_s11  }
 0xba4 PF: > { %s1553_s21 = sand.u32 1, %s2790_s24   ;;  %p3711_p7 = scmp.ne.s32.totalorder %s3670_s19, 0 }
 0xba5   : > { %p3712_p6 = scmp.ge.s32.totalorder %s2810_s29, 2  ;;  %s1554_s7 = scalar_lea.sflag [#allocation6], %s1553_s21 }
 0xba7   : > { %p2082_p11 = pnand %p3712_p6, %p3711_p7 }
 0xba9   : > { %2785 = dma.done.wait (!%p2082_p11), %s1554_s7, 128  }
 0xbaa   : > { %2787 = vsyncadd (!%p2082_p11), %s1554_s7, 4294967168  ;;  %s43_s29 = sadd.s32 1, %s2810_s29   ;;  %s3713_s22 = sld [smem:[#allocation44_spill]] }
 0xbab   : > { %p40_p2 = scmp.ge.s32.totalorder %s43_s29, 4   ;;  %s3714_s24 = smov %s2794_s25 }
 0xbac   : > { %s3715_s25 = smov %s2798_s26  ;;  %s3716_s26 = smov %s3170_s2 }
 0xbad   : > { %s3717_s27 = smov %s2806_s28  ;;  %42 = sbr.rel (!%p40_p2) target bundleno = 34 (0x22), region = 217 }
 0xbb0   : > { %s3718_s28 = smov %s3713_s22 }
 0xbb4   :  { %1559 = vsyncpa [#allocation5], 1 }
 0xbb5   :  { %1561 = vsyncpa [#allocation5 + $0x1], 1 }
 0xbb6   :  { %1562 = vsyncpa [#allocation8], 1 }
 0xbb7   :  { %1564 = vsyncpa [#allocation8 + $0x1], 1 }
 0xbb8   :  { %1565 = vsyncpa [#allocation11], 1 }
 0xbb9   :  { %1566 = vsyncpa [#allocation14], 1 }
 0xbba   :  { %1567 = vsyncpa [#allocation17], 1 }
 0xbbb   :  { %1568 = vsyncpa [#allocation20], 1 }
 0xbbc   :  { %1569 = vsyncpa [#allocation23], 1 }
 0xbbd   :  { %1570 = vsyncpa [#allocation26], 1 }
 0xbbe   :  { %1571 = vsyncpa [#allocation29], 1 }
 0xbbf   :  { %1572 = vsyncpa [#allocation6], 1 }
 0xbc0   :  { %1574 = vsyncpa [#allocation6 + $0x1], 1 }

</bundles_post_ra>
